<compile_context>
chip_gen: v5e
topology: v5e:2x2
jax: 0.10.0
libtpu: 0.0.40
codegen_flags: <defaults>
</compile_context>

<pallas_src>
import functools

import jax
import jax.numpy as jnp
from jax import lax
from jax.experimental import pallas as pl
from jax.experimental.pallas import tpu as pltpu

HIGH = lax.Precision.HIGHEST     # used only in the pure-JAX reference
BN_EPS = 1e-5


def _resblock_coordatt_kernel(
    x_ref,      # (C, L)        input block, L = NB*H*W (batch folded on lanes), f32
    we_ref,     # (T, 9C)       conv_expand weights, im2col order, bf16
    ws_ref,     # (C, T)        conv_squeeze 1x1 weights, bf16
    bs_ref,     # (C, 1)        conv_squeeze bias, f32
    w1_ref,     # (M, C)        CoordAtt conv1 weights (BN folded in), bf16
    b1_ref,     # (M, 1)        CoordAtt conv1 bias   (BN folded in), f32
    wh_ref,     # (C, M)        conv_h 1x1 weights, bf16
    bh_ref,     # (C, 1)        conv_h bias, f32
    ww_ref,     # (C, M)        conv_w 1x1 weights, bf16
    bw_ref,     # (C, 1)        conv_w bias, f32
    mask_ref,   # (9C, L)       combined h/w validity mask per tap (precomputed), f32
    phw_ref,    # (L, NB*(H+W)) block-diag one-hot avg-pool matrix [H-pool | W-pool], bf16
    pht_ref,    # (NB*H, L)     one-hot broadcast-back of the H gate (along W), bf16
    pwt_ref,    # (NB*W, L)     one-hot broadcast-back of the W gate (along H), bf16
    out_ref,    # (C, L)
    *, H, W, NB,
):
    x2 = x_ref[...]                                   # (C, L) f32, lanes = batch*spatial
    L = x2.shape[-1]

    # ---- 3x3 conv (pad=1, no bias): im2col slab built in registers ---------
    # Tap (oy, ox) needs x[p + oy*W + ox]; a lane roll by -(oy*W+ox) provides it.
    # Lanes whose source falls outside the image (h/w out of range, or wrapped
    # across an image boundary / the array end) are exactly the lanes zeroed by
    # the single precomputed mask, so circular wrap is harmless.
    taps = []
    for oy in (-1, 0, 1):
        for ox in (-1, 0, 1):
            d = oy * W + ox
            taps.append(x2 if d == 0 else pltpu.roll(x2, (-d) % L, axis=1))
    xcol = jnp.concatenate(taps, axis=0) * mask_ref[...]           # (9C, L) f32

    t = jnp.dot(we_ref[...], xcol.astype(jnp.bfloat16),
                preferred_element_type=jnp.float32)                # (T, L)
    s = jnp.dot(ws_ref[...], t.astype(jnp.bfloat16),
                preferred_element_type=jnp.float32) + bs_ref[...]  # (C, L)
    r = jnp.maximum(x2 + s, 0.0)                                   # relu residual, f32

    # ---- CoordAtt -----------------------------------------------------------
    # One matmul against a block-diagonal one-hot gives BOTH avg pools
    # (per-H then per-W), feeding one fused conv1 + h_swish (keeps XLU free,
    # halves the number of tiny MXU issues for this stage).
    nh = NB * H
    pool = jnp.dot(r.astype(jnp.bfloat16), phw_ref[...],
                   preferred_element_type=jnp.float32)             # (C, NB*(H+W))
    y = jnp.dot(w1_ref[...], pool.astype(jnp.bfloat16),
                preferred_element_type=jnp.float32) + b1_ref[...]  # (M, NB*(H+W))
    y = y * (jnp.clip(y + 3.0, 0.0, 6.0) * (1.0 / 6.0))            # h_swish, f32
    y_bf = y.astype(jnp.bfloat16)

    g_h = jnp.dot(wh_ref[...], y_bf[:, :nh],
                  preferred_element_type=jnp.float32) + bh_ref[...]   # (C, NB*H)
    g_w = jnp.dot(ww_ref[...], y_bf[:, nh:],
                  preferred_element_type=jnp.float32) + bw_ref[...]   # (C, NB*W)
    a_h = jax.nn.sigmoid(g_h)
    a_w = jax.nn.sigmoid(g_w)

    # Broadcast gates back over the full spatial extent via one-hot matmuls.
    a_h_full = jnp.dot(a_h.astype(jnp.bfloat16), pht_ref[...],
                       preferred_element_type=jnp.float32)         # (C, L)
    a_w_full = jnp.dot(a_w.astype(jnp.bfloat16), pwt_ref[...],
                       preferred_element_type=jnp.float32)         # (C, L)

    out_ref[...] = r * a_h_full * a_w_full          # single lane-dense full store


def residual_block_with_coordatt(x_nchw, p):
    """NCHW in / NCHW out.  The kernel works on (C, NB*H*W) slabs: the batch is
    folded onto the lane axis (one cheap N<->C transpose in the wrapper), with
    NB images per grid step chosen so the grid keeps >= 2 steps for v7x."""
    N, C, H, W = x_nchw.shape
    HW = H * W

    # Images per grid step: largest divisor of N that still leaves >= 2 steps.
    NB = max((d for d in range(1, N + 1) if N % d == 0 and N // d >= 2),
             default=N)
    G = N // NB
    L = NB * HW

    # (N, C, H, W) -> (C, N*HW): fold batch onto lanes (tiny transpose, once).
    x_folded = (x_nchw.reshape(N, C, HW).transpose(1, 0, 2)
                .reshape(C, N * HW).astype(jnp.float32))

    # ---- Hoisted compile-time constants (DMA'd once, resident in VMEM) -----
    pix = jnp.arange(HW, dtype=jnp.int32)
    h_of, w_of = pix // W, pix % W
    tap_masks = []
    for oy in (-1, 0, 1):
        for ox in (-1, 0, 1):
            ok = ((h_of + oy >= 0) & (h_of + oy < H) &
                  (w_of + ox >= 0) & (w_of + ox < W))
            tap_masks.append(ok)
    mask9 = jnp.stack(tap_masks, 0).astype(jnp.float32)               # (9, HW)
    mask = jnp.repeat(mask9[:, None, :], C, axis=1).reshape(9 * C, HW)
    mask = jnp.tile(mask, (1, NB))                                    # (9C, L)

    lane = jnp.arange(L, dtype=jnp.int32)
    img, h_l, w_l = lane // HW, (lane % HW) // W, lane % W
    colH = jnp.arange(NB * H, dtype=jnp.int32)
    colW = jnp.arange(NB * W, dtype=jnp.int32)
    ph = (((img[:, None] == colH[None, :] // H) &
           (h_l[:, None] == colH[None, :] % H)).astype(jnp.float32) / W)
    pw = (((img[:, None] == colW[None, :] // W) &
           (w_l[:, None] == colW[None, :] % W)).astype(jnp.float32) / H)
    phw = jnp.concatenate([ph, pw], axis=1).astype(jnp.bfloat16)      # (L, NB*(H+W))
    pht = ((colH[:, None] // H == img[None, :]) &
           (colH[:, None] % H == h_l[None, :])).astype(jnp.bfloat16)  # (NB*H, L)
    pwt = ((colW[:, None] // W == img[None, :]) &
           (colW[:, None] % W == w_l[None, :])).astype(jnp.bfloat16)  # (NB*W, L)

    consts = (p["we2"], p["ws"], p["bs"], p["w1f"], p["b1f"],
              p["wh"], p["bh"], p["ww"], p["bw"],
              mask, phw, pht, pwt)

    def const_spec(arr):
        nd = arr.ndim
        return pl.BlockSpec(arr.shape, lambda g, _nd=nd: (0,) * _nd)

    kernel = functools.partial(_resblock_coordatt_kernel, H=H, W=W, NB=NB)
    out_folded = pl.pallas_call(
        kernel,
        out_shape=jax.ShapeDtypeStruct((C, N * HW), jnp.float32),
        grid_spec=pltpu.PrefetchScalarGridSpec(
            num_scalar_prefetch=0,
            grid=(G,),
            in_specs=[pl.BlockSpec((C, L), lambda g: (0, g))]
                     + [const_spec(a) for a in consts],
            out_specs=pl.BlockSpec((C, L), lambda g: (0, g)),
        ),
        compiler_params=pltpu.CompilerParams(dimension_semantics=("parallel",)),
    )(x_folded, *consts)

    return (out_folded.reshape(C, N, HW).transpose(1, 0, 2)
            .reshape(N, C, H, W))


def make_params(key, C, T, M):
    """Deterministic synthetic parameters: torch-layout dict (OIHW) for the
    reference, plus kernel-layout dict (im2col / channel-major matrices)."""
    ks = jax.random.split(key, 13)
    sc = 0.1
    w_expand = jax.random.normal(ks[0], (T, C, 3, 3), jnp.float32) * sc   # OIHW
    w_squeeze = jax.random.normal(ks[1], (C, T, 1, 1), jnp.float32) * sc
    b_squeeze = jax.random.normal(ks[2], (C,), jnp.float32) * sc
    w1 = jax.random.normal(ks[3], (M, C, 1, 1), jnp.float32) * sc
    b1 = jax.random.normal(ks[4], (M,), jnp.float32) * sc
    bn_gamma = jax.random.uniform(ks[5], (M,), jnp.float32, 0.5, 1.5)
    bn_beta = jax.random.normal(ks[6], (M,), jnp.float32) * sc
    bn_mean = jax.random.normal(ks[7], (M,), jnp.float32) * sc
    bn_var = jax.random.uniform(ks[8], (M,), jnp.float32, 0.5, 1.5)
    w_h = jax.random.normal(ks[9], (C, M, 1, 1), jnp.float32) * sc
    b_h = jax.random.normal(ks[10], (C,), jnp.float32) * sc
    w_w = jax.random.normal(ks[11], (C, M, 1, 1), jnp.float32) * sc
    b_w = jax.random.normal(ks[12], (C,), jnp.float32) * sc

    torch_p = dict(w_expand=w_expand, w_squeeze=w_squeeze, b_squeeze=b_squeeze,
                   w1=w1, b1=b1, bn_gamma=bn_gamma, bn_beta=bn_beta,
                   bn_mean=bn_mean, bn_var=bn_var,
                   w_h=w_h, b_h=b_h, w_w=w_w, b_w=b_w)

    bn_scale = bn_gamma / jnp.sqrt(bn_var + BN_EPS)
    bn_bias = bn_beta - bn_mean * bn_scale
    kern_p = dict(
        # im2col weight ordering: column k = (dy*3 + dx)*C + c
        we2=jnp.transpose(w_expand, (0, 2, 3, 1))
              .reshape(T, 9 * C).astype(jnp.bfloat16),
        ws=w_squeeze[:, :, 0, 0].astype(jnp.bfloat16),     # (C, T)
        bs=b_squeeze[:, None],                             # (C, 1) f32
        w1f=(w1[:, :, 0, 0] * bn_scale[:, None]).astype(jnp.bfloat16),  # BN folded
        b1f=(b1 * bn_scale + bn_bias)[:, None],            # (M, 1) f32
        wh=w_h[:, :, 0, 0].astype(jnp.bfloat16), bh=b_h[:, None],
        ww=w_w[:, :, 0, 0].astype(jnp.bfloat16), bw=b_w[:, None],
    )
    return torch_p, kern_p


def _conv1x1_nchw(x, w, b):
    out = lax.conv_general_dilated(x, w, (1, 1), ((0, 0), (0, 0)),
                                   dimension_numbers=("NCHW", "OIHW", "NCHW"),
                                   precision=HIGH)
    return out + b[None, :, None, None]


def reference_forward(x, tp):
    """Pure-JAX NCHW reference mirroring the PyTorch module (eval-mode BN)."""
    t = lax.conv_general_dilated(x, tp["w_expand"], (1, 1), ((1, 1), (1, 1)),
                                 dimension_numbers=("NCHW", "OIHW", "NCHW"),
                                 precision=HIGH)
    r = jnp.maximum(x + _conv1x1_nchw(t, tp["w_squeeze"], tp["b_squeeze"]), 0.0)
    n, c, h, w = r.shape
    x_h = jnp.mean(r, axis=3, keepdims=True)                               # (n,c,h,1)
    x_w = jnp.transpose(jnp.mean(r, axis=2, keepdims=True), (0, 1, 3, 2))  # (n,c,w,1)
    y = jnp.concatenate([x_h, x_w], axis=2)
    y = _conv1x1_nchw(y, tp["w1"], tp["b1"])
    y = ((y - tp["bn_mean"][None, :, None, None])
         / jnp.sqrt(tp["bn_var"][None, :, None, None] + BN_EPS)
         * tp["bn_gamma"][None, :, None, None]
         + tp["bn_beta"][None, :, None, None])
    y = y * jnp.clip(y + 3.0, 0.0, 6.0) / 6.0                              # h_swish
    y_h, y_w = y[:, :, :h, :], y[:, :, h:, :]
    y_w = jnp.transpose(y_w, (0, 1, 3, 2))
    a_h = jax.nn.sigmoid(_conv1x1_nchw(y_h, tp["w_h"], tp["b_h"]))
    a_w = jax.nn.sigmoid(_conv1x1_nchw(y_w, tp["w_w"], tp["b_w"]))
    return r * a_w * a_h


if __name__ == "__main__":
    N, C, H, W = 4, 4, 16, 16    # batch 4 -> 2 images per grid step, 2 steps (v7x)
    T = 16                       # tmp_channels
    M = max(8, C // 32)          # CoordAtt mip (reduction=32)

    key = jax.random.PRNGKey(0)
    kx, kp = jax.random.split(key)
    x = jax.random.normal(kx, (N, C, H, W), jnp.float32)
    torch_p, kern_p = make_params(kp, C, T, M)

    out = residual_block_with_coordatt(x, kern_p)
    out = jax.block_until_ready(out)

    ref = reference_forward(x, torch_p)
    assert out.shape == ref.shape == (N, C, H, W)
    assert bool(jnp.all(jnp.isfinite(out)))
    assert bool(jnp.allclose(out, ref, rtol=5e-2, atol=5e-2))
    print("KERNEL_OK")
</pallas_src>

<mosaic_0001>
module attributes {stable_mosaic.version = 11 : i64} {
  func.func @_resblock_coordatt_kernel(%arg0: i32, %arg1: memref<4x512xf32, #tpu.memory_space<vmem>>, %arg2: memref<16x36xbf16, #tpu.memory_space<vmem>>, %arg3: memref<4x16xbf16, #tpu.memory_space<vmem>>, %arg4: memref<4x1xf32, #tpu.memory_space<vmem>>, %arg5: memref<8x4xbf16, #tpu.memory_space<vmem>>, %arg6: memref<8x1xf32, #tpu.memory_space<vmem>>, %arg7: memref<4x8xbf16, #tpu.memory_space<vmem>>, %arg8: memref<4x1xf32, #tpu.memory_space<vmem>>, %arg9: memref<4x8xbf16, #tpu.memory_space<vmem>>, %arg10: memref<4x1xf32, #tpu.memory_space<vmem>>, %arg11: memref<36x512xf32, #tpu.memory_space<vmem>>, %arg12: memref<512x64xbf16, #tpu.memory_space<vmem>>, %arg13: memref<32x512xbf16, #tpu.memory_space<vmem>>, %arg14: memref<32x512xbf16, #tpu.memory_space<vmem>>, %arg15: memref<4x512xf32, #tpu.memory_space<vmem>>) attributes {dimension_semantics = [#tpu.dimension_semantics<parallel>], iteration_bounds = array<i64: 2>, scalar_prefetch = 0 : i64, scratch_operands = 0 : i64, tpu.core_type = #tpu.core_type<tc>, window_params = [{transform_indices = @transform_0, window_bounds = array<i64: 4, 512>}, {pipeline_mode = #tpu.pipeline_mode<synchronous>, transform_indices = @transform_1, window_bounds = array<i64: 16, 36>}, {pipeline_mode = #tpu.pipeline_mode<synchronous>, transform_indices = @transform_2, window_bounds = array<i64: 4, 16>}, {pipeline_mode = #tpu.pipeline_mode<synchronous>, transform_indices = @transform_3, window_bounds = array<i64: 4, 1>}, {pipeline_mode = #tpu.pipeline_mode<synchronous>, transform_indices = @transform_4, window_bounds = array<i64: 8, 4>}, {pipeline_mode = #tpu.pipeline_mode<synchronous>, transform_indices = @transform_5, window_bounds = array<i64: 8, 1>}, {pipeline_mode = #tpu.pipeline_mode<synchronous>, transform_indices = @transform_6, window_bounds = array<i64: 4, 8>}, {pipeline_mode = #tpu.pipeline_mode<synchronous>, transform_indices = @transform_7, window_bounds = array<i64: 4, 1>}, {pipeline_mode = #tpu.pipeline_mode<synchronous>, transform_indices = @transform_8, window_bounds = array<i64: 4, 8>}, {pipeline_mode = #tpu.pipeline_mode<synchronous>, transform_indices = @transform_9, window_bounds = array<i64: 4, 1>}, {pipeline_mode = #tpu.pipeline_mode<synchronous>, transform_indices = @transform_10, window_bounds = array<i64: 36, 512>}, {pipeline_mode = #tpu.pipeline_mode<synchronous>, transform_indices = @transform_11, window_bounds = array<i64: 512, 64>}, {pipeline_mode = #tpu.pipeline_mode<synchronous>, transform_indices = @transform_12, window_bounds = array<i64: 32, 512>}, {pipeline_mode = #tpu.pipeline_mode<synchronous>, transform_indices = @transform_13, window_bounds = array<i64: 32, 512>}, {transform_indices = @transform_14, window_bounds = array<i64: 4, 512>}]} {
    %c0 = arith.constant 0 : index
    %c0_0 = arith.constant 0 : index
    %0 = vector.load %arg1[%c0, %c0_0] : memref<4x512xf32, #tpu.memory_space<vmem>>, vector<4x512xf32>
    %c17_i32 = arith.constant 17 : i32
    %1 = tpu.dynamic_rotate %0 by %c17_i32 dim 1 : vector<4x512xf32>, i32 -> vector<4x512xf32>
    %c16_i32 = arith.constant 16 : i32
    %2 = tpu.dynamic_rotate %0 by %c16_i32 dim 1 : vector<4x512xf32>, i32 -> vector<4x512xf32>
    %c15_i32 = arith.constant 15 : i32
    %3 = tpu.dynamic_rotate %0 by %c15_i32 dim 1 : vector<4x512xf32>, i32 -> vector<4x512xf32>
    %c1_i32 = arith.constant 1 : i32
    %4 = tpu.dynamic_rotate %0 by %c1_i32 dim 1 : vector<4x512xf32>, i32 -> vector<4x512xf32>
    %c511_i32 = arith.constant 511 : i32
    %5 = tpu.dynamic_rotate %0 by %c511_i32 dim 1 : vector<4x512xf32>, i32 -> vector<4x512xf32>
    %c497_i32 = arith.constant 497 : i32
    %6 = tpu.dynamic_rotate %0 by %c497_i32 dim 1 : vector<4x512xf32>, i32 -> vector<4x512xf32>
    %c496_i32 = arith.constant 496 : i32
    %7 = tpu.dynamic_rotate %0 by %c496_i32 dim 1 : vector<4x512xf32>, i32 -> vector<4x512xf32>
    %c495_i32 = arith.constant 495 : i32
    %8 = tpu.dynamic_rotate %0 by %c495_i32 dim 1 : vector<4x512xf32>, i32 -> vector<4x512xf32>
    %9 = tpu.concatenate %1, %2, %3, %4, %0, %5, %6, %7, %8 in 0 : vector<4x512xf32>, vector<4x512xf32>, vector<4x512xf32>, vector<4x512xf32>, vector<4x512xf32>, vector<4x512xf32>, vector<4x512xf32>, vector<4x512xf32>, vector<4x512xf32> -> vector<36x512xf32>
    %c0_1 = arith.constant 0 : index
    %c0_2 = arith.constant 0 : index
    %10 = vector.load %arg11[%c0_1, %c0_2] : memref<36x512xf32, #tpu.memory_space<vmem>>, vector<36x512xf32>
    %11 = arith.mulf %9, %10 : vector<36x512xf32>
    %c0_3 = arith.constant 0 : index
    %c0_4 = arith.constant 0 : index
    %12 = vector.load %arg2[%c0_3, %c0_4] : memref<16x36xbf16, #tpu.memory_space<vmem>>, vector<16x36xbf16>
    %13 = arith.truncf %11 : vector<36x512xf32> to vector<36x512xbf16>
    %cst = arith.constant dense<0.000000e+00> : vector<16x512xf32>
    %14 = tpu.matmul %12, %13, %cst {dimension_numbers = #tpu.dot_dimension_numbers<[1], [0], [0], [1], [0, 0, 1, 1], [], []>} : vector<16x36xbf16>, vector<36x512xbf16>, vector<16x512xf32> -> vector<16x512xf32>
    %c0_5 = arith.constant 0 : index
    %c0_6 = arith.constant 0 : index
    %15 = vector.load %arg3[%c0_5, %c0_6] : memref<4x16xbf16, #tpu.memory_space<vmem>>, vector<4x16xbf16>
    %16 = arith.truncf %14 : vector<16x512xf32> to vector<16x512xbf16>
    %cst_7 = arith.constant dense<0.000000e+00> : vector<4x512xf32>
    %17 = tpu.matmul %15, %16, %cst_7 {dimension_numbers = #tpu.dot_dimension_numbers<[1], [0], [0], [1], [0, 0, 1, 1], [], []>} : vector<4x16xbf16>, vector<16x512xbf16>, vector<4x512xf32> -> vector<4x512xf32>
    %c0_8 = arith.constant 0 : index
    %c0_9 = arith.constant 0 : index
    %18 = vector.load %arg4[%c0_8, %c0_9] : memref<4x1xf32, #tpu.memory_space<vmem>>, vector<4x1xf32>
    %19 = vector.broadcast %18 : vector<4x1xf32> to vector<4x512xf32>
    %20 = arith.addf %17, %19 : vector<4x512xf32>
    %21 = arith.addf %0, %20 : vector<4x512xf32>
    %cst_10 = arith.constant 0.000000e+00 : f32
    %22 = vector.broadcast %cst_10 : f32 to vector<4x512xf32>
    %23 = arith.maximumf %21, %22 : vector<4x512xf32>
    %24 = arith.truncf %23 : vector<4x512xf32> to vector<4x512xbf16>
    %c0_11 = arith.constant 0 : index
    %c0_12 = arith.constant 0 : index
    %25 = vector.load %arg12[%c0_11, %c0_12] : memref<512x64xbf16, #tpu.memory_space<vmem>>, vector<512x64xbf16>
    %cst_13 = arith.constant dense<0.000000e+00> : vector<4x64xf32>
    %26 = tpu.matmul %24, %25, %cst_13 {dimension_numbers = #tpu.dot_dimension_numbers<[1], [0], [0], [1], [0, 0, 1, 1], [], []>} : vector<4x512xbf16>, vector<512x64xbf16>, vector<4x64xf32> -> vector<4x64xf32>
    %c0_14 = arith.constant 0 : index
    %c0_15 = arith.constant 0 : index
    %27 = vector.load %arg5[%c0_14, %c0_15] : memref<8x4xbf16, #tpu.memory_space<vmem>>, vector<8x4xbf16>
    %28 = arith.truncf %26 : vector<4x64xf32> to vector<4x64xbf16>
    %cst_16 = arith.constant dense<0.000000e+00> : vector<8x64xf32>
    %29 = tpu.matmul %27, %28, %cst_16 {dimension_numbers = #tpu.dot_dimension_numbers<[1], [0], [0], [1], [0, 0, 1, 1], [], []>} : vector<8x4xbf16>, vector<4x64xbf16>, vector<8x64xf32> -> vector<8x64xf32>
    %c0_17 = arith.constant 0 : index
    %c0_18 = arith.constant 0 : index
    %30 = vector.load %arg6[%c0_17, %c0_18] : memref<8x1xf32, #tpu.memory_space<vmem>>, vector<8x1xf32>
    %31 = vector.broadcast %30 : vector<8x1xf32> to vector<8x64xf32>
    %32 = arith.addf %29, %31 : vector<8x64xf32>
    %cst_19 = arith.constant 3.000000e+00 : f32
    %33 = vector.broadcast %cst_19 : f32 to vector<8x64xf32>
    %34 = arith.addf %32, %33 : vector<8x64xf32>
    %cst_20 = arith.constant 0.000000e+00 : f32
    %cst_21 = arith.constant 6.000000e+00 : f32
    %35 = vector.broadcast %cst_20 : f32 to vector<8x64xf32>
    %36 = arith.maximumf %35, %34 : vector<8x64xf32>
    %37 = vector.broadcast %cst_21 : f32 to vector<8x64xf32>
    %38 = arith.minimumf %37, %36 : vector<8x64xf32>
    %cst_22 = arith.constant 0.166666672 : f32
    %39 = vector.broadcast %cst_22 : f32 to vector<8x64xf32>
    %40 = arith.mulf %38, %39 : vector<8x64xf32>
    %41 = arith.mulf %32, %40 : vector<8x64xf32>
    %42 = arith.truncf %41 : vector<8x64xf32> to vector<8x64xbf16>
    %c0_23 = arith.constant 0 : index
    %c0_24 = arith.constant 0 : index
    %43 = vector.load %arg7[%c0_23, %c0_24] : memref<4x8xbf16, #tpu.memory_space<vmem>>, vector<4x8xbf16>
    %44 = vector.extract_strided_slice %42 {offsets = [0, 0], sizes = [8, 32], strides = [1, 1]} : vector<8x64xbf16> to vector<8x32xbf16>
    %cst_25 = arith.constant dense<0.000000e+00> : vector<4x32xf32>
    %45 = tpu.matmul %43, %44, %cst_25 {dimension_numbers = #tpu.dot_dimension_numbers<[1], [0], [0], [1], [0, 0, 1, 1], [], []>} : vector<4x8xbf16>, vector<8x32xbf16>, vector<4x32xf32> -> vector<4x32xf32>
    %c0_26 = arith.constant 0 : index
    %c0_27 = arith.constant 0 : index
    %46 = vector.load %arg8[%c0_26, %c0_27] : memref<4x1xf32, #tpu.memory_space<vmem>>, vector<4x1xf32>
    %47 = vector.broadcast %46 : vector<4x1xf32> to vector<4x32xf32>
    %48 = arith.addf %45, %47 : vector<4x32xf32>
    %c0_28 = arith.constant 0 : index
    %c0_29 = arith.constant 0 : index
    %49 = vector.load %arg9[%c0_28, %c0_29] : memref<4x8xbf16, #tpu.memory_space<vmem>>, vector<4x8xbf16>
    %50 = vector.extract_strided_slice %42 {offsets = [0, 32], sizes = [8, 32], strides = [1, 1]} : vector<8x64xbf16> to vector<8x32xbf16>
    %cst_30 = arith.constant dense<0.000000e+00> : vector<4x32xf32>
    %51 = tpu.matmul %49, %50, %cst_30 {dimension_numbers = #tpu.dot_dimension_numbers<[1], [0], [0], [1], [0, 0, 1, 1], [], []>} : vector<4x8xbf16>, vector<8x32xbf16>, vector<4x32xf32> -> vector<4x32xf32>
    %c0_31 = arith.constant 0 : index
    %c0_32 = arith.constant 0 : index
    %52 = vector.load %arg10[%c0_31, %c0_32] : memref<4x1xf32, #tpu.memory_space<vmem>>, vector<4x1xf32>
    %53 = vector.broadcast %52 : vector<4x1xf32> to vector<4x32xf32>
    %54 = arith.addf %51, %53 : vector<4x32xf32>
    %55 = arith.negf %48 : vector<4x32xf32>
    %56 = math.exp %55 : vector<4x32xf32>
    %cst_33 = arith.constant 1.000000e+00 : f32
    %57 = vector.broadcast %cst_33 : f32 to vector<4x32xf32>
    %58 = arith.addf %57, %56 : vector<4x32xf32>
    %59 = arith.divf %57, %58 : vector<4x32xf32>
    %60 = arith.negf %54 : vector<4x32xf32>
    %61 = math.exp %60 : vector<4x32xf32>
    %cst_34 = arith.constant 1.000000e+00 : f32
    %62 = vector.broadcast %cst_34 : f32 to vector<4x32xf32>
    %63 = arith.addf %62, %61 : vector<4x32xf32>
    %64 = arith.divf %62, %63 : vector<4x32xf32>
    %65 = arith.truncf %59 : vector<4x32xf32> to vector<4x32xbf16>
    %c0_35 = arith.constant 0 : index
    %c0_36 = arith.constant 0 : index
    %66 = vector.load %arg13[%c0_35, %c0_36] : memref<32x512xbf16, #tpu.memory_space<vmem>>, vector<32x512xbf16>
    %cst_37 = arith.constant dense<0.000000e+00> : vector<4x512xf32>
    %67 = tpu.matmul %65, %66, %cst_37 {dimension_numbers = #tpu.dot_dimension_numbers<[1], [0], [0], [1], [0, 0, 1, 1], [], []>} : vector<4x32xbf16>, vector<32x512xbf16>, vector<4x512xf32> -> vector<4x512xf32>
    %68 = arith.truncf %64 : vector<4x32xf32> to vector<4x32xbf16>
    %c0_38 = arith.constant 0 : index
    %c0_39 = arith.constant 0 : index
    %69 = vector.load %arg14[%c0_38, %c0_39] : memref<32x512xbf16, #tpu.memory_space<vmem>>, vector<32x512xbf16>
    %cst_40 = arith.constant dense<0.000000e+00> : vector<4x512xf32>
    %70 = tpu.matmul %68, %69, %cst_40 {dimension_numbers = #tpu.dot_dimension_numbers<[1], [0], [0], [1], [0, 0, 1, 1], [], []>} : vector<4x32xbf16>, vector<32x512xbf16>, vector<4x512xf32> -> vector<4x512xf32>
    %71 = arith.mulf %23, %67 : vector<4x512xf32>
    %72 = arith.mulf %71, %70 : vector<4x512xf32>
    %c0_41 = arith.constant 0 : index
    %c0_42 = arith.constant 0 : index
    %73 = vector.load %arg15[%c0_41, %c0_42] : memref<4x512xf32, #tpu.memory_space<vmem>>, vector<4x512xf32>
    tpu.vector_store %arg15[%c0_41, %c0_42], %72 {strides = array<i32>} : memref<4x512xf32, #tpu.memory_space<vmem>>, vector<4x512xf32>,
    return
  }
  func.func @transform_0(%arg0: i32) -> (i32, i32) {
    %c0_i32 = arith.constant 0 : i32
    %c0_i32_0 = arith.constant 0 : i32
    return %c0_i32, %arg0 : i32, i32
  }
  func.func @transform_1(%arg0: i32) -> (i32, i32) {
    %c0_i32 = arith.constant 0 : i32
    %c0_i32_0 = arith.constant 0 : i32
    %c0_i32_1 = arith.constant 0 : i32
    return %c0_i32, %c0_i32_0 : i32, i32
  }
  func.func @transform_2(%arg0: i32) -> (i32, i32) {
    %c0_i32 = arith.constant 0 : i32
    %c0_i32_0 = arith.constant 0 : i32
    %c0_i32_1 = arith.constant 0 : i32
    return %c0_i32, %c0_i32_0 : i32, i32
  }
  func.func @transform_3(%arg0: i32) -> (i32, i32) {
    %c0_i32 = arith.constant 0 : i32
    %c0_i32_0 = arith.constant 0 : i32
    %c0_i32_1 = arith.constant 0 : i32
    return %c0_i32, %c0_i32_0 : i32, i32
  }
  func.func @transform_4(%arg0: i32) -> (i32, i32) {
    %c0_i32 = arith.constant 0 : i32
    %c0_i32_0 = arith.constant 0 : i32
    %c0_i32_1 = arith.constant 0 : i32
    return %c0_i32, %c0_i32_0 : i32, i32
  }
  func.func @transform_5(%arg0: i32) -> (i32, i32) {
    %c0_i32 = arith.constant 0 : i32
    %c0_i32_0 = arith.constant 0 : i32
    %c0_i32_1 = arith.constant 0 : i32
    return %c0_i32, %c0_i32_0 : i32, i32
  }
  func.func @transform_6(%arg0: i32) -> (i32, i32) {
    %c0_i32 = arith.constant 0 : i32
    %c0_i32_0 = arith.constant 0 : i32
    %c0_i32_1 = arith.constant 0 : i32
    return %c0_i32, %c0_i32_0 : i32, i32
  }
  func.func @transform_7(%arg0: i32) -> (i32, i32) {
    %c0_i32 = arith.constant 0 : i32
    %c0_i32_0 = arith.constant 0 : i32
    %c0_i32_1 = arith.constant 0 : i32
    return %c0_i32, %c0_i32_0 : i32, i32
  }
  func.func @transform_8(%arg0: i32) -> (i32, i32) {
    %c0_i32 = arith.constant 0 : i32
    %c0_i32_0 = arith.constant 0 : i32
    %c0_i32_1 = arith.constant 0 : i32
    return %c0_i32, %c0_i32_0 : i32, i32
  }
  func.func @transform_9(%arg0: i32) -> (i32, i32) {
    %c0_i32 = arith.constant 0 : i32
    %c0_i32_0 = arith.constant 0 : i32
    %c0_i32_1 = arith.constant 0 : i32
    return %c0_i32, %c0_i32_0 : i32, i32
  }
  func.func @transform_10(%arg0: i32) -> (i32, i32) {
    %c0_i32 = arith.constant 0 : i32
    %c0_i32_0 = arith.constant 0 : i32
    %c0_i32_1 = arith.constant 0 : i32
    return %c0_i32, %c0_i32_0 : i32, i32
  }
  func.func @transform_11(%arg0: i32) -> (i32, i32) {
    %c0_i32 = arith.constant 0 : i32
    %c0_i32_0 = arith.constant 0 : i32
    %c0_i32_1 = arith.constant 0 : i32
    return %c0_i32, %c0_i32_0 : i32, i32
  }
  func.func @transform_12(%arg0: i32) -> (i32, i32) {
    %c0_i32 = arith.constant 0 : i32
    %c0_i32_0 = arith.constant 0 : i32
    %c0_i32_1 = arith.constant 0 : i32
    return %c0_i32, %c0_i32_0 : i32, i32
  }
  func.func @transform_13(%arg0: i32) -> (i32, i32) {
    %c0_i32 = arith.constant 0 : i32
    %c0_i32_0 = arith.constant 0 : i32
    %c0_i32_1 = arith.constant 0 : i32
    return %c0_i32, %c0_i32_0 : i32, i32
  }
  func.func @transform_14(%arg0: i32) -> (i32, i32) {
    %c0_i32 = arith.constant 0 : i32
    %c0_i32_0 = arith.constant 0 : i32
    return %c0_i32, %arg0 : i32, i32
  }
}

</mosaic_0001>

<bundles_post_ra>
// kernel: tpu_custom_call.1
= control target key start
LH: loop header
LB: loop body
LE: loop exit
PB: predicated region body
PF: predicated region fallthrough
CT: control target
= control target key end

     0   :  { %s2838_s0 = inlined_call_operand.vmem [shape: f32[4,1024], index: 0, kind: input, shape index: {}]   ;;  %s2839_s1 = inlined_call_operand.vmem [shape: bf16[16,36], index: 1, kind: input, shape index: {}]   ;;  %s2840_s2 = inlined_call_operand.vmem [shape: bf16[4,16], index: 2, kind: input, shape index: {}]   ;;  %s2841_s3 = inlined_call_operand.vmem [shape: f32[4,1], index: 3, kind: input, shape index: {}]   ;;  %s2842_s4 = inlined_call_operand.vmem [shape: bf16[8,4], index: 4, kind: input, shape index: {}]   ;;  %s2843_s5 = inlined_call_operand.vmem [shape: f32[8,1], index: 5, kind: input, shape index: {}]   ;;  %s2844_s6 = inlined_call_operand.vmem [shape: bf16[4,8], index: 6, kind: input, shape index: {}]   ;;  %s2845_s7 = inlined_call_operand.vmem [shape: f32[4,1], index: 7, kind: input, shape index: {}]   ;;  %s2846_s8 = inlined_call_operand.vmem [shape: bf16[4,8], index: 8, kind: input, shape index: {}]   ;;  %s2847_s9 = inlined_call_operand.vmem [shape: f32[4,1], index: 9, kind: input, shape index: {}]   ;;  %s2848_s10 = inlined_call_operand.vmem [shape: f32[36,512], index: 10, kind: input, shape index: {}]   ;;  %s2849_s11 = inlined_call_operand.vmem [shape: bf16[512,64], index: 11, kind: input, shape index: {}]   ;;  %s2850_s12 = inlined_call_operand.vmem [shape: bf16[32,512], index: 12, kind: input, shape index: {}]   ;;  %s2851_s13 = inlined_call_operand.vmem [shape: bf16[32,512], index: 13, kind: input, shape index: {}]   ;;  %s2852_s14 = inlined_call_operand.hbm [shape: f32[4,1024], index: 14, kind: output, shape index: {}]  }
   0x1   :  { %2854 = sst [smem:[#allocation5_spill]] %s2838_s0 }
   0x2   :  { %2855 = sst [smem:[#allocation6_spill]] %s2839_s1 }
   0x3   :  { %2856 = sst [smem:[#allocation7_spill]] %s2840_s2 }
   0x4   :  { %2857 = sst [smem:[#allocation8_spill]] %s2841_s3 }
   0x5   :  { %19 = vsyncpa [#allocation3], 0 }
   0x6   :  { %21 = vsyncpa [#allocation3 + $0x1], 0  ;;  %s2211_s29 = smov 0   ;;  %s2213_s30 = smov 0  }
   0x7   :  { %s2215_s15 = smov 0   ;;  %s2217_s16 = smov 0  }
   0x8 LB: > { %s2232_s17 = sadd.s32 4294967295, %s2124_s16   ;;  %s1723_s18 = sadd.s32 4294967294, %s2124_s16   ;;  %s2124_s16 = sphi %s2217_s16, %s2868_s16   ;;  %s2120_s15 = sphi %s2215_s15, %s2867_s15   ;;  %s2116_s30 = sphi %s2213_s30, %s2866_s30   ;;  %s2112_s29 = sphi %s2211_s29, %s2865_s29  }
   0x9   : > { %s2236_s19 = sadd.s32 1, %s2124_s16   ;;  %s333_s20 = sadd.s32 1, %s2120_s15 }
   0xa   : > { %s330_s21 = ssub.s32 %s2124_s16, %s2236_s19  ;;  %p343_p0 = scmp.ne.s32.totalorder %s2120_s15, %s2116_s30 }
   0xb   : > { %p331_p1 = scmp.eq.s32.totalorder %s330_s21, 0  ;;  %p344_p2 = scmp.eq.s32.totalorder %s2232_s17, 1 }
   0xc   : > { %p349_p3 = scmp.ne.s32.totalorder %s2116_s30, %s2112_s29  ;;  %p350_p4 = scmp.eq.s32.totalorder %s1723_s18, 1 }
   0xd   : > { %s2247_s22 = scalar_select %p331_p1, %s2120_s15, %s333_s20  }
   0xe   : > { %p2249_p5 = por %p344_p2, %p343_p0  ;;  %p2253_p6 = por %p350_p4, %p349_p3 }
   0xf   : > { %p1726_p7 = scmp.ge.s32.totalorder %s2124_s16, 1  ;;  %p416_p8 = scmp.lt.s32.totalorder %s2124_s16, 3 }
  0x11   : > { %p417_p9 = pnand %p1726_p7, %p416_p8 }
  0x12   : > { %s1728_s25 = sshll.u32 (!%p417_p9), %s2232_s17, 2  ;;  %s2860_s0 = sld [smem:[#allocation5_spill]] (!%p417_p9) }
  0x13   : > { %420 = sbr.rel (%p417_p9) target bundleno = 1250 (0x4e2), region = 76  ;;  %p463_p10 = scmp.lt.s32.totalorder (!%p417_p9), %s1728_s25, 7 }
  0x14   : > { %s2853_s20 = smov (!%p417_p9), 17   ;;  %s2127_s21 = smov (!%p417_p9), 16  }
  0x15   : > { %s2130_s27 = smov (!%p417_p9), 127   ;;  %s2131_s28 = smov (!%p417_p9), 113  }
  0x16   : > { %s2862_s1 = sld [smem:[#allocation6_spill]] (!%p417_p9) }
  0x17   : > { %s2863_s3 = sld [smem:[#allocation8_spill]] (!%p417_p9) }
  0x18   : > { %s2870_s25 = smov (!%p463_p10, %s1728_s25), 7  ;;  %v493_v52 = vlaneseq  ;;  %v763_v61 = vld [vmem:[%s2848_s10 + $0x98] sm:$0xf]  ;;  %vm727_vm7 = vcmask 1043456   ;;  %vm807_vm9 = vcmask 1041408   ;;  %vm803_vm10 = vcmask 293888  }
  0x19   : > { %s1729_s26 = sshll.u32 %s2870_s25, 2  ;;  %s2128_s25 = smov 15   ;;  %vm887_vm11 = vcmask 130048   ;;  %vm1290_vm12 = vcmask 31744   ;;  %vm1323_vm13 = vcmask 64512  }
  0x1a   : > { %s466_s18 = scalar_lea.vmem %s2860_s0, %s1729_s26  ;;  %s2129_s26 = smov 1   ;;  %v2342_v53 = vand.u32 127, %v493_v52 }
  0x1b   : > { %v2263_v0 = vld [vmem:[%s466_s18 + $0x8] sm:$0xff]  ;;  %v2265_v1 = vld [vmem:[%s466_s18] sm:$0xff]  ;;  %s2132_s18 = smov 112   ;;  %s2861_s0 = smov 17  }
  0x1c   : > { %476 = vst [vmem:[#allocation1 + $0x10] ss:$2 sm:$0xff] %v2263_v0  ;;  %vm591_vm0 = vcmp.lt.s32.totalorder %v2342_v53, 127  ;;  %vm639_vm1 = vcmp.lt.s32.totalorder %v2342_v53, 112  ;;  %vm567_vm2 = vcmp.lt.s32.totalorder %v2342_v53, 1  ;;  %vm519_vm3 = vcmp.lt.s32.totalorder %v2342_v53, 16 }
  0x1d   : > { %474 = vst [vmem:[#allocation1] ss:$2 sm:$0xff] %v2265_v1  ;;  %vm615_vm4 = vcmp.lt.s32.totalorder %v2342_v53, 113  ;;  %vm663_vm5 = vcmp.lt.s32.totalorder %v2342_v53, 111  ;;  %vm543_vm6 = vcmp.lt.s32.totalorder %v2342_v53, 15  ;;  %vm495_vm8 = vcmp.lt.s32.totalorder %v2342_v53, 17 }
  0x1e   : > { %v2134_v53 = vmov 0   ;;  %s2864_s2 = sld [smem:[#allocation7_spill]] }
  0x1f   : > { %2051 = vset.pattern.permute.xlu2 %v2134_v53  ;;  %2052 = vset.pattern.permute.xlu0 %v2134_v53 }
  0x20   : > { %2053 = vset.pattern.permute.xlu1 %v2134_v53 }
  0x23   : > { %v479_v2 = vld.sshfl [vmem:[#allocation1 + $0x10] sm:$0xff pattern:$0x75316420]  ;;  %v480_v3 = vld.sshfl [vmem:[#allocation1 + $0x18] sm:$0xff pattern:$0x75316420] }
  0x24   : > { %489 = vrot.lane.b32.xlu1 %v479_v2, %s2853_s20  ;;  %491 = vrot.lane.b32.xlu2 %v480_v3, %s2853_s20  ;;  %502 = vst [vmem:[#allocation1 + $0x10] ss:$2 sm:$0xff] %v2263_v0  ;;  %v478_v4 = vld.sshfl [vmem:[#allocation1 + $0x8] sm:$0xff pattern:$0x75316420] }
  0x25   : > { %v2272_v5 = vld.sshfl [vmem:[#allocation1] sm:$0xff pattern:$0x75316420] }
  0x26   : > { %500 = vst [vmem:[#allocation1] ss:$2 sm:$0xff] %v2265_v1 }
  0x2b   : > { %v506_v6 = vld.sshfl [vmem:[#allocation1 + $0x18] sm:$0xff pattern:$0x75316420]  ;;  %v505_v7 = vld.sshfl [vmem:[#allocation1 + $0x10] sm:$0xff pattern:$0x75316420] }
  0x2c   : > { %517 = vrot.lane.b32.xlu0 %v506_v6, %s2127_s21  ;;  %487 = vrot.lane.b32.xlu1 %v478_v4, %s2853_s20  ;;  %526 = vst [vmem:[#allocation1 + $0x10] ss:$2 sm:$0xff] %v2263_v0  ;;  %s2133_s20 = smov 111  }
  0x2d   : > { %515 = vrot.lane.b32.xlu2 %v505_v7, %s2127_s21  ;;  %v504_v8 = vld.sshfl [vmem:[#allocation1 + $0x8] sm:$0xff pattern:$0x75316420]  ;;  %v503_v9 = vld.sshfl [vmem:[#allocation1] sm:$0xff pattern:$0x75316420] }
  0x2e   : > { %524 = vst [vmem:[#allocation1] ss:$2 sm:$0xff] %v2265_v1 }
  0x33   : > { %v529_v10 = vld.sshfl [vmem:[#allocation1 + $0x10] sm:$0xff pattern:$0x75316420]  ;;  %v530_v11 = vld.sshfl [vmem:[#allocation1 + $0x18] sm:$0xff pattern:$0x75316420] }
  0x34   : > { %539 = vrot.lane.b32.xlu1 %v529_v10, %s2128_s25  ;;  %513 = vrot.lane.b32.xlu0 %v504_v8, %s2127_s21  ;;  %550 = vst [vmem:[#allocation1 + $0x10] ss:$2 sm:$0xff] %v2263_v0  ;;  %v755_v10 = vld [vmem:[%s2848_s10 + $0x58] sm:$0xff] }
  0x35   : > { %v527_v12 = vld.sshfl [vmem:[#allocation1] sm:$0xff pattern:$0x75316420]  ;;  %v528_v13 = vld.sshfl [vmem:[#allocation1 + $0x8] sm:$0xff pattern:$0x75316420]  ;;  %541 = vrot.lane.b32.xlu2 %v530_v11, %s2128_s25 }
  0x36   : > { %548 = vst [vmem:[#allocation1] ss:$2 sm:$0xff] %v2265_v1 }
  0x3b   : > { %v553_v14 = vld.sshfl [vmem:[#allocation1 + $0x10] sm:$0xff pattern:$0x75316420]  ;;  %v554_v15 = vld.sshfl [vmem:[#allocation1 + $0x18] sm:$0xff pattern:$0x75316420] }
  0x3c   : > { %563 = vrot.lane.b32.xlu1 %v553_v14, %s2129_s26  ;;  %574 = vst [vmem:[#allocation1 + $0x10] ss:$2 sm:$0xff] %v2263_v0 }
  0x3d   : > { %565 = vrot.lane.b32.xlu2 %v554_v15, %s2129_s26  ;;  %v552_v16 = vld.sshfl [vmem:[#allocation1 + $0x8] sm:$0xff pattern:$0x75316420]  ;;  %v551_v17 = vld.sshfl [vmem:[#allocation1] sm:$0xff pattern:$0x75316420] }
  0x3e   : > { %561 = vrot.lane.b32.xlu0 %v552_v16, %s2129_s26  ;;  %572 = vst [vmem:[#allocation1] ss:$2 sm:$0xff] %v2265_v1 }
  0x43   : > { %v577_v18 = vld.sshfl [vmem:[#allocation1 + $0x10] sm:$0xff pattern:$0x75316420]  ;;  %v578_v19 = vld.sshfl [vmem:[#allocation1 + $0x18] sm:$0xff pattern:$0x75316420] }
  0x44   : > { %598 = vst [vmem:[#allocation1 + $0x10] ss:$2 sm:$0xff] %v2263_v0 }
  0x45   : > { %v576_v20 = vld.sshfl [vmem:[#allocation1 + $0x8] sm:$0xff pattern:$0x75316420]  ;;  %v575_v21 = vld.sshfl [vmem:[#allocation1] sm:$0xff pattern:$0x75316420] }
  0x46   : > { %583 = vrot.lane.b32.xlu1 %v575_v21, %s2130_s27  ;;  %596 = vst [vmem:[#allocation1] ss:$2 sm:$0xff] %v2265_v1 }
  0x4b   : > { %v602_v22 = vld.sshfl [vmem:[#allocation1 + $0x18] sm:$0xff pattern:$0x75316420]  ;;  %v601_v23 = vld.sshfl [vmem:[#allocation1 + $0x10] sm:$0xff pattern:$0x75316420] }
  0x4c   : > { %613 = vrot.lane.b32.xlu0 %v602_v22, %s2131_s28  ;;  %622 = vst [vmem:[#allocation1 + $0x10] ss:$2 sm:$0xff] %v2263_v0 }
  0x4d   : > { %v599_v24 = vld.sshfl [vmem:[#allocation1] sm:$0xff pattern:$0x75316420]  ;;  %v600_v25 = vld.sshfl [vmem:[#allocation1 + $0x8] sm:$0xff pattern:$0x75316420] }
  0x4e   : > { %589 = vrot.lane.b32.xlu1 %v578_v19, %s2130_s27  ;;  %607 = vrot.lane.b32.xlu2 %v599_v24, %s2131_s28  ;;  %620 = vst [vmem:[#allocation1] ss:$2 sm:$0xff] %v2265_v1 }
  0x53   : > { %v625_v26 = vld.sshfl [vmem:[#allocation1 + $0x10] sm:$0xff pattern:$0x75316420]  ;;  %v626_v27 = vld.sshfl [vmem:[#allocation1 + $0x18] sm:$0xff pattern:$0x75316420] }
  0x54   : > { %611 = vrot.lane.b32.xlu0 %v601_v23, %s2131_s28  ;;  %646 = vst [vmem:[#allocation1 + $0x10] ss:$2 sm:$0xff] %v2263_v0 }
  0x55   : > { %v623_v28 = vld.sshfl [vmem:[#allocation1] sm:$0xff pattern:$0x75316420]  ;;  %v624_v29 = vld.sshfl [vmem:[#allocation1 + $0x8] sm:$0xff pattern:$0x75316420] }
  0x56   : > { %587 = vrot.lane.b32.xlu1 %v577_v18, %s2130_s27  ;;  %631 = vrot.lane.b32.xlu2 %v623_v28, %s2132_s18  ;;  %644 = vst [vmem:[#allocation1] ss:$2 sm:$0xff] %v2265_v1 }
  0x5b   : > { %v650_v30 = vld.sshfl [vmem:[#allocation1 + $0x18] sm:$0xff pattern:$0x75316420]  ;;  %v649_v31 = vld.sshfl [vmem:[#allocation1 + $0x10] sm:$0xff pattern:$0x75316420] }
  0x5c   : > { %694 = vst [vmem:[#allocation1 + $0x10] ss:$2 sm:$0xff] %v2263_v0 }
  0x5d   : > { %v647_v32 = vld.sshfl [vmem:[#allocation1] sm:$0xff pattern:$0x75316420]  ;;  %v648_v33 = vld.sshfl [vmem:[#allocation1 + $0x8] sm:$0xff pattern:$0x75316420] }
  0x5e   : > { %635 = vrot.lane.b32.xlu1 %v625_v26, %s2132_s18  ;;  %637 = vrot.lane.b32.xlu2 %v626_v27, %s2132_s18  ;;  %692 = vst [vmem:[#allocation1] ss:$2 sm:$0xff] %v2265_v1  ;;  %v762_v27 = vld [vmem:[%s2848_s10 + $0x90] sm:$0xf] }
  0x5f   : > { %655 = vrot.lane.b32.xlu0 %v647_v32, %s2133_s20 }
  0x63   : > { %v698_v62 = vld.sshfl [vmem:[#allocation1 + $0x18] sm:$0xff pattern:$0x75316420]  ;;  %v697_v28 = vld.sshfl [vmem:[#allocation1 + $0x10] sm:$0xff pattern:$0x75316420] }
  0x66   : > { %585 = vrot.lane.b32.xlu1 %v576_v20, %s2130_s27  ;;  %537 = vrot.lane.b32.xlu2 %v528_v13, %s2128_s25  ;;  %s459_s27 = sand.u32 1, %s2116_s30  }
  0x67   : > { %661 = vrot.lane.b32.xlu0 %v650_v30, %s2133_s20 }
  0x6e   : > { %511 = vrot.lane.b32.xlu1 %v503_v9, %s2127_s21  ;;  %633 = vrot.lane.b32.xlu2 %v624_v29, %s2132_s18  ;;  %s2135_s21 = smov 96   ;;  %s1727_s18 = sshll.u32 %s459_s27, 4 }
  0x6f   : > { %659 = vrot.lane.b32.xlu0 %v649_v31, %s2133_s20 }
  0x76   : > { %535 = vrot.lane.b32.xlu1 %v527_v12, %s2128_s25  ;;  %559 = vrot.lane.b32.xlu2 %v551_v17, %s2129_s26  ;;  %v759_v17 = vld [vmem:[%s2848_s10 + $0x78] sm:$0xff]  ;;  %s1648_s25 = scalar_lea.sflag [#allocation3], %s459_s27 }
  0x77   : > { %609 = vrot.lane.b32.xlu0 %v600_v25, %s2131_s28  ;;  %v751_v25 = vld [vmem:[%s2848_s10 + $0x38] sm:$0xff]  ;;  %s2001_s28 = sshll.u32 %s2232_s17, 4 }
  0x7e   : > { %v2312_v34 = vpop.permute.xlu2 %491 }
  0x7f   : > { %657 = vrot.lane.b32.xlu0 %v648_v33, %s2133_s20  ;;  %v747_v33 = vld [vmem:[%s2848_s10 + $0x18] sm:$0xff]  ;;  %s461_s20 = scalar_lea.vmem [#allocation2], %s1727_s18 }
  0x87   : > { %485 = vrot.lane.b32.xlu0 %v2272_v5, %s2861_s0  ;;  %v2316_v36 = vpop.permute.xlu2 %515  ;;  %s1659_s0 = scalar_lea.hbm %s2852_s14, %s2001_s28 }
  0x88   : > { %s1663_s17 = sshll.u32 %s1659_s0, 4  ;;  %s1664_s17 = int_to_ptr.hbm [resolvable:$true] %s1663_s17 }
  0x8f   : > { %v2324_v40 = vpop.permute.xlu2 %541 }
  0x96   : > { %v2314_v35 = vpop.permute.xlu1 %489 }
  0x97   : > { %v2328_v43 = vpop.permute.xlu2 %565  ;;  %v496_v18 = vsel %vm495_vm8, %v2314_v35, %v2312_v34 }
  0x9e   : > { %v2318_v37 = vpop.permute.xlu1 %487  ;;  %v2320_v38 = vpop.permute.xlu0 %517 }
  0x9f   : > { %v520_v3 = vsel %vm519_vm3, %v2316_v36, %v2320_v38 }
  0xa0   : > { %v675_v14 = vrot.slane %v520_v3, 4 }
  0xa2   : > { %v731_v32 = vsel %vm727_vm7, %v496_v18, %v675_v14 }
  0xa6   : > { %v2322_v39 = vpop.permute.xlu1 %539  ;;  %v2326_v41 = vpop.permute.xlu0 %513 }
  0xa7   : > { %v544_v11 = vsel %vm543_vm6, %v2322_v39, %v2324_v40  ;;  %v521_v29 = vsel %vm519_vm3, %v2326_v41, %v2316_v36 }
  0xa8   : > { %v2334_v46 = vpop.permute.xlu2 %607 }
  0xae   : > { %v564_v42 = vpop.permute.xlu1 %563 }
  0xaf   : > { %v568_v60 = vsel %vm567_vm2, %v564_v42, %v2328_v43 }
  0xb0   : > { %v2330_v44 = vpop.permute.xlu0 %561  ;;  %v2336_v49 = vpop.permute.xlu2 %631  ;;  %v687_v7 = vrot.slane %v568_v60, 4  ;;  %v758_v60 = vld [vmem:[%s2848_s10 + $0x70] sm:$0xff] }
  0xb1   : > { %v569_v30 = vsel %vm567_vm2, %v2330_v44, %v564_v42 }
  0xb2   : > { %v735_v24 = vsel %vm727_vm7, %v544_v11, %v687_v7  ;;  %v497_v11 = vsel %vm495_vm8, %v2318_v37, %v2314_v35 }
  0xb3   : > { %v771_v36 = vmul.f32 %v751_v25, %v735_v24  ;;  %v695_v25 = vld.sshfl [vmem:[#allocation1] sm:$0xff pattern:$0x75316420] }
  0xb8   : > { %v2332_v45 = vpop.permute.xlu1 %583  ;;  %v638_v54 = vpop.permute.xlu2 %637 }
  0xb9   : > { %v643_v58 = vsel %vm639_vm1, %v638_v54, %v2336_v49 }
  0xba   : > { %v722_v63 = vrot.slane %v643_v58, 4 }
  0xbe   : > { %v614_v47 = vpop.permute.xlu0 %613 }
  0xbf   : > { %v619_v4 = vsel %vm615_vm4, %v614_v47, %v2334_v46 }
  0xc0   : > { %v590_v48 = vpop.permute.xlu1 %589  ;;  %v2374_v5 = vpop.permute.xlu2 %537  ;;  %v743_v15 = vsel %vm727_vm7, %v619_v4, %v722_v63  ;;  %v674_v63 = vrot.slane %v521_v29, 4 }
  0xc1   : > { %v595_v56 = vsel %vm591_vm0, %v590_v48, %v2332_v45  ;;  %v779_v26 = vmul.f32 %v759_v17, %v743_v15  ;;  %v746_v15 = vld [vmem:[%s2848_s10 + $0x10] sm:$0xff] }
  0xc2   : > { %v710_v59 = vrot.slane %v595_v56, 4  ;;  %v730_v14 = vsel %vm727_vm7, %v497_v11, %v674_v63 }
  0xc3   : > { %v766_v18 = vmul.f32 %v746_v15, %v730_v14  ;;  %v745_v14 = vld [vmem:[%s2848_s10 + $0x8] sm:$0xff] }
  0xc4   : > { %v739_v9 = vsel %vm727_vm7, %v698_v62, %v710_v59  ;;  %v754_v59 = vld [vmem:[%s2848_s10 + $0x50] sm:$0xff]  ;;  %v767_v62 = vmul.f32 %v747_v33, %v731_v32  ;;  %v749_v15 = vld [vmem:[%s2848_s10 + $0x28] sm:$0xff] }
  0xc5   : > { %v775_v20 = vmul.f32 %v755_v10, %v739_v9  ;;  %v2443_v10 = vld [vmem:[%s2862_s1] sm:$0xff]  ;;  %s2082_s1 = scalar_lea.hbm %s2852_s14, 32 }
  0xc6   : > { %v2338_v50 = vpop.permute.xlu0 %611  ;;  %v789_v4 = vpack.c.bf16 %v771_v36, %v767_v62  ;;  %v752_v62 = vld [vmem:[%s2848_s10 + $0x40] sm:$0xff] }
  0xc8   : > { %v2340_v51 = vpop.permute.xlu1 %587 }
  0xc9   : > { %v592_v12 = vsel %vm591_vm0, %v2340_v51, %v590_v48  ;;  %v616_v48 = vsel %vm615_vm4, %v2338_v50, %v614_v47  ;;  %v545_v47 = vsel %vm543_vm6, %v2374_v5, %v2322_v39  ;;  %v750_v39 = vld [vmem:[%s2848_s10 + $0x30] sm:$0xff] }
  0xca   : > { %v709_v21 = vrot.slane %v592_v12, 4 }
  0xcc   : > { %v738_v58 = vsel %vm727_vm7, %v697_v28, %v709_v21 }
  0xd0   : > { %v2351_v57 = vpop.permute.xlu1 %635 }
  0xd1   : > { %v2345_v55 = vpop.permute.xlu0 %655  ;;  %v640_v13 = vsel %vm639_vm1, %v2351_v57, %v638_v54  ;;  %v793_v54 = vpack.c.bf16 %v779_v26, %v775_v20 }
  0xd2   : > { %v721_v22 = vrot.slane %v640_v13, 4 }
  0xd4   : > { %v742_v42 = vsel %vm727_vm7, %v616_v48, %v721_v22 }
  0xd5   : > { %v778_v7 = vmul.f32 %v758_v60, %v742_v42 }
  0xd8   : > { %v586_v19 = vpop.permute.xlu1 %585 }
  0xd9   : > { %v662_v2 = vpop.permute.xlu0 %661  ;;  %v593_v35 = vsel %vm591_vm0, %v586_v19, %v2340_v51  ;;  %v594_v20 = vsel %vm591_vm0, %v2332_v45, %v586_v19 }
  0xda   : > { %v667_v6 = vsel %vm663_vm5, %v662_v2, %v2345_v55  ;;  %v707_v26 = vrot.slane %v594_v20, 4 }
  0xdb   : > { %v783_v8 = vmul.f32 %v763_v61, %v667_v6  ;;  %v634_v61 = vpop.permute.xlu2 %633  ;;  %v774_v6 = vmul.f32 %v754_v59, %v738_v58 }
  0xdc   : > { %v642_v21 = vsel %vm639_vm1, %v2336_v49, %v634_v61  ;;  %v641_v22 = vsel %vm639_vm1, %v634_v61, %v2351_v57  ;;  %v760_v49 = vld [vmem:[%s2848_s10 + $0x80] sm:$0xf]  ;;  %v761_v57 = vld [vmem:[%s2848_s10 + $0x88] sm:$0xf]  ;;  %v736_v58 = vsel %vm727_vm7, %v695_v25, %v707_v26 }
  0xdd   : > { %v797_v16 = vpack.c.bf16 %v783_v8, %v783_v8  ;;  %v719_v19 = vrot.slane %v642_v21, 4  ;;  %v720_v28 = vrot.slane %v641_v22, 4 }
  0xdf   : > { %v818_v23 = vsel %vm807_vm9, %v797_v16, 0  ;;  %v792_v16 = vpack.c.bf16 %v778_v7, %v774_v6 }
  0xe0   : > { %867 = vmatpush.bf16.msra.mxu3 %v818_v23  ;;  %v512_v12 = vpop.permute.xlu1 %511 }
  0xe1   : > { %v660_v31 = vpop.permute.xlu0 %659  ;;  %v522_v59 = vsel %vm519_vm3, %v512_v12, %v2326_v41  ;;  %v523_v63 = vsel %vm519_vm3, %v2320_v38, %v512_v12  ;;  %v748_v38 = vld [vmem:[%s2848_s10 + $0x20] sm:$0xff] }
  0xe2   : > { %v664_v52 = vsel %vm663_vm5, %v660_v31, %v662_v2  ;;  %v686_v2 = vrot.slane %v569_v30, 4  ;;  %v696_v30 = vld.sshfl [vmem:[#allocation1 + $0x8] sm:$0xff pattern:$0x75316420]  ;;  %v673_v11 = vrot.slane %v522_v59, 4  ;;  %v1973_v59 = vld [vmem:[%s2849_s11 + $0xa0] sm:$0xff] }
  0xe3   : > { %v782_v56 = vmul.f32 %v762_v27, %v664_v52  ;;  %v560_v23 = vpop.permute.xlu2 %559  ;;  %v708_v27 = vrot.slane %v593_v35, 4 }
  0xe4   : > { %868 = vmatpush.bf16.msra.mxu3 %v793_v54  ;;  %v734_v8 = vsel %vm727_vm7, %v545_v47, %v686_v2  ;;  %v571_v29 = vsel %vm567_vm2, %v2328_v43, %v560_v23  ;;  %v756_v43 = vld [vmem:[%s2848_s10 + $0x60] sm:$0xff] }
  0xe5   : > { %v796_v3 = vpack.c.bf16 %v782_v56, %v782_v56  ;;  %v770_v17 = vmul.f32 %v750_v39, %v734_v8  ;;  %v684_v56 = vrot.slane %v571_v29, 4  ;;  %v737_v42 = vsel %vm727_vm7, %v696_v30, %v708_v27 }
  0xe6   : > { %v772_v8 = vmul.f32 %v752_v62, %v736_v58  ;;  %v672_v39 = vrot.slane %v523_v63, 4  ;;  %v1959_v58 = vld [vmem:[%s2849_s11 + $0x30] sm:$0xff]  ;;  %v1972_v62 = vld [vmem:[%s2849_s11 + $0x98] sm:$0xff]  ;;  %v1957_v63 = vld [vmem:[%s2849_s11 + $0x20] sm:$0xff] }
  0xe7   : > { %v815_v9 = vsel %vm807_vm9, %v796_v3, 0  ;;  %v788_v24 = vpack.c.bf16 %v770_v17, %v766_v18 }
  0xe8   : > { %853 = vmatpush.bf16.msra.mxu2 %v815_v9  ;;  %869 = vmatpush.bf16.msra.mxu3 %v789_v4  ;;  %v536_v32 = vpop.permute.xlu1 %535 }
  0xe9   : > { %v610_v13 = vpop.permute.xlu0 %609  ;;  %v547_v60 = vsel %vm543_vm6, %v2324_v40, %v536_v32  ;;  %v546_v41 = vsel %vm543_vm6, %v536_v32, %v2374_v5 }
  0xea   : > { %v617_v51 = vsel %vm615_vm4, %v610_v13, %v2338_v50  ;;  %v618_v45 = vsel %vm615_vm4, %v2334_v46, %v610_v13  ;;  %v732_v7 = vsel %vm727_vm7, %v547_v60, %v684_v56  ;;  %v744_v13 = vld [vmem:[%s2848_s10] sm:$0xff]  ;;  %v1982_v56 = vld [vmem:[%s2849_s11 + $0xe8] sm:$0xff] }
  0xeb   : > { %1737 = vmatmul.msk.bf16.vlgmr.msra.gmra.mxu3 %vm803_vm10, %v2443_v10  ;;  %v740_v48 = vsel %vm727_vm7, %v618_v45, %v719_v19  ;;  %v741_v52 = vsel %vm727_vm7, %v617_v51, %v720_v28  ;;  %v768_v22 = vmul.f32 %v748_v38, %v732_v7  ;;  %v1317_v51 = vld [vmem:[%s2845_s7] sm:$0xf]  ;;  %v1983_v28 = vld [vmem:[%s2849_s11 + $0xf0] sm:$0xff]  ;;  %v1978_v7 = vld [vmem:[%s2849_s11 + $0xc8] sm:$0xff] }
  0xec   : > { %854 = vmatpush.bf16.msra.mxu2 %v792_v16  ;;  %v776_v2 = vmul.f32 %v756_v43, %v740_v48  ;;  %v876_v19 = vld [vmem:[%s2864_s2] sm:$0x3]  ;;  %v1960_v43 = vld [vmem:[%s2849_s11 + $0x38] sm:$0xff] }
  0xed   : > { %v1981_v60 = vld [vmem:[%s2849_s11 + $0xe0] sm:$0xff] }
  0xee   : > { %v790_v18 = vpack.c.bf16 %v776_v2, %v772_v8  ;;  %v1971_v2 = vld [vmem:[%s2849_s11 + $0x90] sm:$0xff]  ;;  %v1969_v38 = vld [vmem:[%s2849_s11 + $0x80] sm:$0xff] }
  0xef   : > { %v1955_v8 = vld [vmem:[%s2849_s11 + $0x10] sm:$0xff] }
  0xf0   : > { %855 = vmatpush.bf16.msra.mxu2 %v788_v24 }
  0xf1   : > { %v658_v50 = vpop.permute.xlu0 %657 }
  0xf2   : > { %v665_v46 = vsel %vm663_vm5, %v658_v50, %v660_v31  ;;  %v666_v33 = vsel %vm663_vm5, %v2345_v55, %v658_v50  ;;  %v757_v31 = vld [vmem:[%s2848_s10 + $0x68] sm:$0xff]  ;;  %v570_v55 = vsel %vm567_vm2, %v560_v23, %v2330_v44  ;;  %v1976_v50 = vld [vmem:[%s2849_s11 + $0xb8] sm:$0xff]  ;;  %vm1461_vm2 = vcmask 261120  }
  0xf3   : > { %1736 = vmatmul.msk.bf16.vlgmr.msra.gmra.mxu2 %vm803_vm10, %v2443_v10  ;;  %v780_v54 = vmul.f32 %v760_v49, %v666_v33  ;;  %v781_v36 = vmul.f32 %v761_v57, %v665_v46  ;;  %v753_v44 = vld [vmem:[%s2848_s10 + $0x48] sm:$0xff]  ;;  %v777_v40 = vmul.f32 %v757_v31, %v741_v52  ;;  %v685_v3 = vrot.slane %v570_v55, 4  ;;  %v1975_v33 = vld [vmem:[%s2849_s11 + $0xb0] sm:$0xff]  ;;  %v1968_v31 = vld [vmem:[%s2849_s11 + $0x78] sm:$0xff] }
  0xf4   : > { %v773_v9 = vmul.f32 %v753_v44, %v737_v42  ;;  %v1974_v55 = vld [vmem:[%s2849_s11 + $0xa8] sm:$0xff]  ;;  %v1967_v42 = vld [vmem:[%s2849_s11 + $0x70] sm:$0xff]  ;;  %v1980_v44 = vld [vmem:[%s2849_s11 + $0xd8] sm:$0xff] }
  0xf5   : > { %v794_v47 = vpack.c.bf16 %v780_v54, %v780_v54  ;;  %v795_v61 = vpack.c.bf16 %v781_v36, %v781_v36  ;;  %v733_v5 = vsel %vm727_vm7, %v546_v41, %v685_v3  ;;  %v1965_v41 = vld [vmem:[%s2849_s11 + $0x60] sm:$0xff]  ;;  %v1956_v3 = vld [vmem:[%s2849_s11 + $0x18] sm:$0xff] }
  0xf6   : > { %v791_v35 = vpack.c.bf16 %v777_v40, %v773_v9  ;;  %v769_v25 = vmul.f32 %v749_v15, %v733_v5  ;;  %v1979_v40 = vld [vmem:[%s2849_s11 + $0xd0] sm:$0xff]  ;;  %v1962_v5 = vld [vmem:[%s2849_s11 + $0x48] sm:$0xff] }
  0xf7   : > { %v809_v4 = vsel %vm807_vm9, %v794_v47, 0  ;;  %v812_v6 = vsel %vm807_vm9, %v795_v61, 0  ;;  %v1958_v47 = vld [vmem:[%s2849_s11 + $0x28] sm:$0xff]  ;;  %v1963_v9 = vld [vmem:[%s2849_s11 + $0x50] sm:$0xff] }
  0xf8   : > { %825 = vmatpush.bf16.msra.mxu0 %v809_v4  ;;  %839 = vmatpush.bf16.msra.mxu1 %v812_v6  ;;  %v1966_v61 = vld [vmem:[%s2849_s11 + $0x68] sm:$0xff]  ;;  %v1964_v4 = vld [vmem:[%s2849_s11 + $0x58] sm:$0xff] }
  0xf9   : > { %v486_v12 = vpop.permute.xlu0 %485  ;;  %v1970_v6 = vld [vmem:[%s2849_s11 + $0x88] sm:$0xff] }
  0xfa   : > { %v498_v16 = vsel %vm495_vm8, %v486_v12, %v2318_v37  ;;  %v499_v17 = vsel %vm495_vm8, %v2312_v34, %v486_v12  ;;  %v881_v37 = vld [vmem:[%s2863_s3] sm:$0xf]  ;;  %s2076_s3 = sshra.s32 %s1664_s17, 4  ;;  %s2077_s3 = int_to_ptr.hbm [resolvable:$true] %s2076_s3 }
  0xfb   : > { %v728_v20 = vsel %vm727_vm7, %v499_v17, %v672_v39  ;;  %v729_v21 = vsel %vm727_vm7, %v498_v16, %v673_v11  ;;  %884 = vperm.xlu2 %2051, %v881_v37   ;;  %v1977_v39 = vld [vmem:[%s2849_s11 + $0xc0] sm:$0xff]  ;;  %v1954_v11 = vld [vmem:[%s2849_s11 + $0x8] sm:$0xff]  ;;  %s2078_s26 = scalar_lea.hbm %s2077_s3, 16  ;;  %p2083_p0 = scmp.lt.s32.totalorder %s2077_s3, %s2852_s14 }
  0xfc   : > { %826 = vmatpush.bf16.msra.mxu0 %v790_v18  ;;  %840 = vmatpush.bf16.msra.mxu1 %v791_v35  ;;  %v764_v23 = vmul.f32 %v744_v13, %v728_v20  ;;  %v765_v24 = vmul.f32 %v745_v14, %v729_v21  ;;  %v1953_v12 = vld [vmem:[%s2849_s11] sm:$0xff]  ;;  %p2079_p11 = scmp.ne.s32.totalorder %s2077_s3, %s2078_s26  ;;  %p2084_p1 = scmp.lt.s32.totalorder %s2082_s1, %s2078_s26 }
  0xfd   : > { %v1961_v13 = vld [vmem:[%s2849_s11 + $0x40] sm:$0xff] }
  0xfe   : > { %v786_v26 = vpack.c.bf16 %v768_v22, %v764_v23  ;;  %v787_v27 = vpack.c.bf16 %v769_v25, %v765_v24  ;;  %p2080_p12 = pnand %p2079_p11, %p2249_p5  ;;  %p2085_p2 = por %p2084_p1, %p2083_p0 }
 0x100   : > { %827 = vmatpush.bf16.msra.mxu0 %v786_v26  ;;  %841 = vmatpush.bf16.msra.mxu1 %v787_v27  ;;  %p2081_p13 = pneg %p2080_p12 }
 0x102   : > { %p2086_p3 = pnand %p2085_p2, %p2081_p13 }
 0x103   : > { %1734 = vmatmul.msk.bf16.vlgmr.msra.gmra.mxu0 %vm803_vm10, %v2443_v10  ;;  %1735 = vmatmul.msk.bf16.vlgmr.msra.gmra.mxu1 %vm803_vm10, %v2443_v10  ;;  %v1984_v10 = vld [vmem:[%s2849_s11 + $0xf8] sm:$0xff] }
 0x104   : > { %1320 = vperm.xlu2 %2051, %v1317_v51  }
 0x155   : > { %v885_v15 = vpop.permute.xlu2 %884 }
 0x16e   : > { %v871_v34 = vpop.f32.mrf.mxu3 }
 0x176   : > { %v857_v45 = vpop.f32.mrf.mxu2  ;;  %v873_v49 = vpop.f32.mrf.mxu3 }
 0x177   : > { %v880_v57 = vpack.c.bf16 %v873_v49, %v871_v34 }
 0x179   : > { %937 = vmatpush.bf16.msrb.mxu3 %v880_v57 }
 0x17c   : > { %1741 = vmatmul.msk.bf16.vlgmr.msrb.gmra.mxu3 %vm887_vm11, %v876_v19 }
 0x17d   : > { %1269 = vmatpush.bf16.msra.mxu3 %v1984_v10 }
 0x17e   : > { %v859_v29 = vpop.f32.mrf.mxu2 }
 0x17f   : > { %v879_v30 = vpack.c.bf16 %v859_v29, %v857_v45 }
 0x180   : > { %v829_v32 = vpop.f32.mrf.mxu0  ;;  %v843_v46 = vpop.f32.mrf.mxu1 }
 0x181   : > { %1270 = vmatpush.bf16.msra.mxu3 %v1983_v28  ;;  %924 = vmatpush.bf16.msrb.mxu2 %v879_v30 }
 0x184   : > { %1740 = vmatmul.msk.bf16.vlgmr.msrb.gmra.mxu2 %vm887_vm11, %v876_v19 }
 0x185   : > { %1256 = vmatpush.bf16.msra.mxu2 %v1976_v50  ;;  %1271 = vmatpush.bf16.msra.mxu3 %v1982_v56 }
 0x188   : > { %v831_v48 = vpop.f32.mrf.mxu0  ;;  %v845_v52 = vpop.f32.mrf.mxu1 }
 0x189   : > { %1257 = vmatpush.bf16.msra.mxu2 %v1975_v33  ;;  %v877_v54 = vpack.c.bf16 %v831_v48, %v829_v32  ;;  %v878_v36 = vpack.c.bf16 %v845_v52, %v843_v46  ;;  %1272 = vmatpush.bf16.msra.mxu3 %v1981_v60  ;;  %v1282_v60 = vld [vmem:[%s2842_s4] sm:$0xf] }
 0x18b   : > { %898 = vmatpush.bf16.msrb.mxu0 %v877_v54  ;;  %911 = vmatpush.bf16.msrb.mxu1 %v878_v36 }
 0x18d   : > { %1258 = vmatpush.bf16.msra.mxu2 %v1974_v55  ;;  %1273 = vmatpush.bf16.msra.mxu3 %v1980_v44 }
 0x18e   : > { %1738 = vmatmul.msk.bf16.vlgmr.msrb.gmra.mxu0 %vm887_vm11, %v876_v19  ;;  %1739 = vmatmul.msk.bf16.vlgmr.msrb.gmra.mxu1 %vm887_vm11, %v876_v19 }
 0x18f   : > { %1230 = vmatpush.bf16.msra.mxu0 %v1960_v43  ;;  %1243 = vmatpush.bf16.msra.mxu1 %v1968_v31 }
 0x191   : > { %1259 = vmatpush.bf16.msra.mxu2 %v1973_v59  ;;  %1274 = vmatpush.bf16.msra.mxu3 %v1979_v40 }
 0x193   : > { %1231 = vmatpush.bf16.msra.mxu0 %v1959_v58  ;;  %1244 = vmatpush.bf16.msra.mxu1 %v1967_v42 }
 0x195   : > { %1260 = vmatpush.bf16.msra.mxu2 %v1972_v62  ;;  %1275 = vmatpush.bf16.msra.mxu3 %v1978_v7 }
 0x197   : > { %1232 = vmatpush.bf16.msra.mxu0 %v1958_v47  ;;  %1245 = vmatpush.bf16.msra.mxu1 %v1966_v61 }
 0x199   : > { %1261 = vmatpush.bf16.msra.mxu2 %v1971_v2  ;;  %1276 = vmatpush.bf16.msra.mxu3 %v1977_v39 }
 0x19b   : > { %1233 = vmatpush.bf16.msra.mxu0 %v1957_v63  ;;  %1246 = vmatpush.bf16.msra.mxu1 %v1965_v41 }
 0x19d   : > { %1262 = vmatpush.bf16.msra.mxu2 %v1970_v6 }
 0x19f   : > { %1234 = vmatpush.bf16.msra.mxu0 %v1956_v3  ;;  %1247 = vmatpush.bf16.msra.mxu1 %v1964_v4 }
 0x1a1   : > { %1263 = vmatpush.bf16.msra.mxu2 %v1969_v38  ;;  %v1344_v38 = vld [vmem:[%s2847_s9] sm:$0xf] }
 0x1a3   : > { %1235 = vmatpush.bf16.msra.mxu0 %v1955_v8  ;;  %1248 = vmatpush.bf16.msra.mxu1 %v1963_v9  ;;  %v1316_v8 = vld [vmem:[%s2844_s6] sm:$0x3] }
 0x1a7   : > { %1236 = vmatpush.bf16.msra.mxu0 %v1954_v11  ;;  %1249 = vmatpush.bf16.msra.mxu1 %v1962_v5  ;;  %v1343_v5 = vld [vmem:[%s2846_s8] sm:$0x3] }
 0x1ab   : > { %1237 = vmatpush.bf16.msra.mxu0 %v1953_v12  ;;  %1250 = vmatpush.bf16.msra.mxu1 %v1961_v13  ;;  %v1893_v12 = vld [vmem:[%s2850_s12 + $0x20] sm:$0xf]  ;;  %v1991_v13 = vld [vmem:[%s2850_s12 + $0x2c] sm:$0xf0] }
 0x1ff   : > { %v939_v14 = vpop.f32.mrf.mxu3 }
 0x200   : > { %v940_v16 = vadd.f32 %v939_v14, %v885_v15  ;;  %v1989_v14 = vld [vmem:[%s2850_s12 + $0x24] sm:$0xf] }
 0x202   : > { %v948_v17 = vrot.slane %v940_v16, 4  ;;  %v1895_v16 = vld [vmem:[%s2850_s12 + $0x30] sm:$0xf0] }
 0x207   : > { %v926_v18 = vpop.f32.mrf.mxu2  ;;  %v941_v35 = vpop.f32.mrf.mxu3 }
 0x208   : > { %v927_v20 = vadd.f32 %v926_v18, %v885_v15  ;;  %v1992_v18 = vld [vmem:[%s2850_s12 + $0x34] sm:$0xf0]  ;;  %v1898_v35 = vor.u32 %v1989_v14, %v1895_v16  ;;  %v1994_v14 = vld [vmem:[%s2851_s13 + $0xc] sm:$0xf]  ;;  %v1923_v16 = vld [vmem:[%s2851_s13 + $0x18] sm:$0xf0] }
 0x20a   : > { %v950_v21 = vsel %vm727_vm7, %v927_v20, %v948_v17  ;;  %v1901_v17 = vld [vmem:[%s2850_s12 + $0x28] sm:$0xf] }
 0x20b   : > { %v2662_v22 = vadd.f32 %v950_v21, %v2263_v0  ;;  %v900_v23 = vpop.f32.mrf.mxu0  ;;  %v913_v24 = vpop.f32.mrf.mxu1  ;;  %v1902_v20 = vor.u32 %v1992_v18, %v1901_v17  ;;  %v1990_v21 = vld [vmem:[%s2850_s12 + $0x2c] sm:$0xf]  ;;  %v1926_v18 = vor.u32 %v1994_v14, %v1923_v16 }
 0x20c   : > { %v914_v25 = vadd.f32 %v913_v24, %v885_v15  ;;  %v901_v27 = vadd.f32 %v900_v23, %v885_v15  ;;  %v1894_v15 = vor.u32 %v1991_v13, %v1893_v12  ;;  %v1903_v23 = vld [vmem:[%s2850_s12 + $0x38] sm:$0xf0]  ;;  %v1877_v24 = vld [vmem:[%s2850_s12] sm:$0xf]  ;;  %v1921_v12 = vld [vmem:[%s2851_s13 + $0x8] sm:$0xf] }
 0x20d   : > { %v956_v26 = vmax.f32 %v2662_v22, 0.0  ;;  %v1996_v13 = vld [vmem:[%s2851_s13 + $0x14] sm:$0xf0] }
 0x20e   : > { %v947_v34 = vrot.slane %v914_v25, 4  ;;  %1471 = vmatpush.bf16.msrb.mxu3 %v1894_v15  ;;  %v1906_v25 = vor.u32 %v1990_v21, %v1903_v23  ;;  %v1922_v15 = vor.u32 %v1996_v13, %v1921_v12 }
 0x20f   : > { %961 = vst [vmem:[#allocation1 + $0x10] ss:$2 sm:$0xff] %v956_v26  ;;  %v928_v37 = vpop.f32.mrf.mxu2 }
 0x210   : > { %v949_v53 = vsel %vm727_vm7, %v901_v27, %v947_v34  ;;  %v1987_v27 = vld [vmem:[%s2850_s12 + $0xc] sm:$0xf0]  ;;  %v1985_v34 = vld [vmem:[%s2850_s12 + $0x4] sm:$0xf]  ;;  %v1879_v37 = vld [vmem:[%s2850_s12 + $0x10] sm:$0xf0] }
 0x211   : > { %v2669_v51 = vadd.f32 %v949_v53, %v2265_v1  ;;  %v1284_v1 = vld [vmem:[%s2843_s5] sm:$0xff]  ;;  %v1878_v53 = vor.u32 %v1987_v27, %v1877_v24 }
 0x212   : > { %1287 = vperm.xlu0 %2052, %v1284_v1  }
 0x213   : > { %v955_v45 = vmax.f32 %v2669_v51, 0.0  ;;  %v902_v0 = vpop.f32.mrf.mxu0  ;;  %v915_v49 = vpop.f32.mrf.mxu1  ;;  %1472 = vmatpush.bf16.msrb.mxu3 %v1878_v53 }
 0x214   : > { %v1882_v0 = vor.u32 %v1985_v34, %v1879_v37  ;;  %v1885_v49 = vld [vmem:[%s2850_s12 + $0x8] sm:$0xf] }
 0x215   : > { %959 = vst [vmem:[#allocation1] ss:$2 sm:$0xff] %v955_v45 }
 0x216   : > { %v964_v10 = vld.sshfl [vmem:[#allocation1 + $0x10] sm:$0xff pattern:$0x75316420]  ;;  %v965_v57 = vld.sshfl [vmem:[#allocation1 + $0x18] sm:$0xff pattern:$0x75316420] }
 0x217   : > { %v972_v19 = vpack.c.bf16 %v964_v10, %v964_v10  ;;  %v973_v28 = vpack.c.bf16 %v965_v57, %v965_v57  ;;  %v1988_v10 = vld [vmem:[%s2850_s12 + $0x14] sm:$0xf0]  ;;  %v1986_v57 = vld [vmem:[%s2850_s12 + $0xc] sm:$0xf] }
 0x219   : > { %1264 = vmatmul.bf16.vlgmr.msra.gmra.mxu2 %v972_v19  ;;  %1277 = vmatmul.bf16.vlgmr.msra.gmra.mxu3 %v973_v28  ;;  %v1886_v19 = vor.u32 %v1988_v10, %v1885_v49  ;;  %v1887_v28 = vld [vmem:[%s2850_s12 + $0x18] sm:$0xf0] }
 0x21c   : > { %v962_v29 = vld.sshfl [vmem:[#allocation1] sm:$0xff pattern:$0x75316420]  ;;  %v963_v50 = vld.sshfl [vmem:[#allocation1 + $0x8] sm:$0xff pattern:$0x75316420] }
 0x21d   : > { %v970_v30 = vpack.c.bf16 %v962_v29, %v962_v29  ;;  %v971_v32 = vpack.c.bf16 %v963_v50, %v963_v50  ;;  %v1890_v29 = vor.u32 %v1986_v57, %v1887_v28  ;;  %v1321_v50 = vpop.permute.xlu2 %1320 }
 0x21f   : > { %1238 = vmatmul.bf16.vlgmr.msra.gmra.mxu0 %v970_v30  ;;  %1251 = vmatmul.bf16.vlgmr.msra.gmra.mxu1 %v971_v32 }
 0x284   : > { %v1288_v47 = vpop.permute.xlu0 %1287 }
 0x29c   : > { %v1239_v46 = vpop.f32.mrf.mxu0  ;;  %v1252_v33 = vpop.f32.mrf.mxu1 }
 0x29d   : > { %v1253_v48 = vadd.f32 %v1252_v33, %v1239_v46  ;;  %v1265_v52 = vpop.f32.mrf.mxu2  ;;  %v1278_v54 = vpop.f32.mrf.mxu3 }
 0x29f   : > { %v1266_v36 = vadd.f32 %v1265_v52, %v1253_v48 }
 0x2a1   : > { %v1279_v43 = vadd.f32 %v1278_v54, %v1266_v36 }
 0x2a3   : > { %v1283_v31 = vpack.c.bf16 %v1279_v43, %v1279_v43 }
 0x2a4   : > { %v1241_v55 = vpop.f32.mrf.mxu0  ;;  %v1254_v56 = vpop.f32.mrf.mxu1 }
 0x2a5   : > { %v1295_v58 = vsel %vm807_vm9, %v1283_v31, 0  ;;  %v1267_v42 = vpop.f32.mrf.mxu2  ;;  %v1280_v59 = vpop.f32.mrf.mxu3 }
 0x2a6   : > { %1304 = vmatpush.bf16.msrb.mxu0 %v1295_v58 }
 0x2a9   : > { %1870 = vmatmul.msk.bf16.vlgmr.msrb.gmra.mxu0 %vm1290_vm12, %v1282_v60 }
 0x2aa   : > { %1484 = vmatpush.bf16.msra.mxu0 %v1898_v35 }
 0x2ae   : > { %1485 = vmatpush.bf16.msra.mxu0 %v1882_v0 }
 0x326   : > { %v1306_v61 = vpop.f32.mrf.mxu0 }
 0x327   : > { %v1307_v62 = vadd.f32 %v1306_v61, %v1288_v47  ;;  %v1929_v47 = vld [vmem:[%s2851_s13 + $0x20] sm:$0xf]  ;;  %v1999_v61 = vld [vmem:[%s2851_s13 + $0x2c] sm:$0xf0] }
 0x329   : > { %v1310_v44 = vadd.f32 3.0, %v1307_v62 }
 0x32b   : > { %v1311_v63 = vmax.f32 %v1310_v44, 0.0  ;;  %v1930_v44 = vor.u32 %v1999_v61, %v1929_v47 }
 0x32d   : > { %v1312_v41 = vmin.f32 %v1311_v63, 6.0  ;;  %v1931_v63 = vld [vmem:[%s2851_s13 + $0x30] sm:$0xf0]  ;;  %1575 = vmatpush.bf16.msra.mxu3 %v1930_v44 }
 0x32e   : > { %v1308_v2 = vpop.f32.mrf.mxu0 }
 0x32f   : > { %v1313_v40 = vmul.f32 0.16666667, %v1312_v41  ;;  %v1937_v41 = vld [vmem:[%s2851_s13 + $0x28] sm:$0xf]  ;;  %v2000_v2 = vld [vmem:[%s2851_s13 + $0x34] sm:$0xf0] }
 0x331   : > { %v1314_v3 = vmul.f32 %v1313_v40, %v1307_v62  ;;  %v1997_v62 = vld [vmem:[%s2851_s13 + $0x24] sm:$0xf] }
 0x332   : > { %v1934_v40 = vor.u32 %v1997_v62, %v1931_v63 }
 0x333   : > { %v1315_v4 = vpack.c.bf16 %v1314_v3, %v1314_v3  ;;  %v1938_v3 = vor.u32 %v2000_v2, %v1937_v41 }
 0x334   : > { %1588 = vmatpush.bf16.msrb.mxu0 %v1934_v40 }
 0x335   : > { %v1328_v6 = vsel %vm727_vm7, %v1315_v4, 0  ;;  %v1351_v7 = vunpack.c.l.b16 %v1315_v4  ;;  %v1998_v4 = vld [vmem:[%s2851_s13 + $0x2c] sm:$0xf] }
 0x336   : > { %1337 = vmatpush.bf16.msrb.mxu1 %v1328_v6  ;;  %v1939_v6 = vld [vmem:[%s2851_s13 + $0x38] sm:$0xf0] }
 0x337   : > { %v1352_v9 = vpack.c.b16 %v1351_v7, %v1351_v7  ;;  %v1913_v7 = vld [vmem:[%s2851_s13] sm:$0xf] }
 0x339   : > { %1353 = vrot.lane.b32.xlu1 %v1352_v9, %s2135_s21  ;;  %1871 = vmatmul.msk.bf16.vlgmr.msrb.gmra.mxu1 %vm1323_vm13, %v1316_v8  ;;  %v1942_v8 = vor.u32 %v1998_v4, %v1939_v6  ;;  %v1995_v9 = vld [vmem:[%s2851_s13 + $0xc] sm:$0xf0]  ;;  %s1661_s21 = sshll.u32 %s461_s20, 4  ;;  %s1662_s21 = int_to_ptr.vmem [resolvable:$true] %s1661_s21 }
 0x33a   : > { %1497 = vmatpush.bf16.msra.mxu1 %v1902_v20 }
 0x33e   : > { %1498 = vmatpush.bf16.msra.mxu1 %v1886_v19 }
 0x341   : > { %1347 = vperm.xlu1 %2053, %v1344_v38   ;;  %v1993_v38 = vld [vmem:[%s2851_s13 + $0x4] sm:$0xf] }
 0x342   : > { %1601 = vmatpush.bf16.msrb.mxu1 %v1938_v3 }
 0x346   : > { %1602 = vmatpush.bf16.msrb.mxu1 %v1922_v15 }
 0x3ab   : > { %v1354_v39 = vpop.permute.xlu1 %1353 }
 0x3ac   : > { %v1359_v11 = vsel %vm727_vm7, %v1354_v39, 0  ;;  %v1915_v39 = vld [vmem:[%s2851_s13 + $0x10] sm:$0xf0] }
 0x3ad   : > { %1368 = vmatpush.bf16.msrb.mxu2 %v1359_v11  ;;  %v1914_v11 = vor.u32 %v1995_v9, %v1913_v7 }
 0x3af   : > { %1576 = vmatpush.bf16.msra.mxu3 %v1914_v11 }
 0x3b0   : > { %1872 = vmatmul.msk.bf16.vlgmr.msrb.gmra.mxu2 %vm1323_vm13, %v1343_v5  ;;  %v1918_v5 = vor.u32 %v1993_v38, %v1915_v39 }
 0x3b1   : > { %1510 = vmatpush.bf16.msra.mxu2 %v1906_v25 }
 0x3b2   : > { %1589 = vmatpush.bf16.msrb.mxu0 %v1918_v5 }
 0x3b3   : > { %v1348_v17 = vpop.permute.xlu1 %1347 }
 0x3b5   : > { %1511 = vmatpush.bf16.msra.mxu2 %v1890_v29 }
 0x3b6   : > { %v1339_v30 = vpop.f32.mrf.mxu1 }
 0x3b7   : > { %v1340_v32 = vadd.f32 %v1339_v30, %v1321_v50 }
 0x3b9   : > { %v1873_v1 = vmul.f32 -1.442695, %v1340_v32  ;;  %1614 = vmatpush.bf16.msrb.mxu2 %v1942_v8 }
 0x3bb   : > { %2054 = vpow2.f32 %v1873_v1 }
 0x3bd   : > { %1615 = vmatpush.bf16.msrb.mxu2 %v1926_v18 }
 0x3be   : > { %v1341_v46 = vpop.f32.mrf.mxu1 }
 0x3c1   : > { %v2055_v33 = vpop.eup %2054 }
 0x3c2   : > { %v1377_v48 = vadd.f32 1.0, %v2055_v33 }
 0x3c4   : > { %2056 = vrcp.f32 %v1377_v48  ;;  %v1389_v43 = vand.u32 2147483648, %v1377_v48  ;;  %v1387_v55 = vand.u32 2147483647, %v1377_v48  ;;  %vm1383_vm15 = vweird.f32 %v1377_v48 }
 0x3c6   : > { %v1390_v58 = vor.u32 1.1754944e-38, %v1389_v43  ;;  %vm1388_vm1 = vcmp.eq.f32.partialorder %v1387_v55, 8.507059e+37 }
 0x3ca   : > { %v2057_v52 = vpop.eup %2056 }
 0x3cb   : > { %v1379_v54 = vmul.f32 %v2057_v52, %v1377_v48  ;;  %vm1384_vm14 = vweird.f32 %v2057_v52 }
 0x3cc   : > { %vm1385_vm0 = vmor %vm1383_vm15, %vm1384_vm14 }
 0x3cd   : > { %v1380_v36 = vsub.f32 1.0, %v1379_v54 }
 0x3cf   : > { %v1381_v31 = vmul.f32 %v2057_v52, %v1380_v36 }
 0x3d1   : > { %v1382_v56 = vadd.f32 %v2057_v52, %v1381_v31 }
 0x3d3   : > { %v1386_v42 = vsel %vm1385_vm0, %v2057_v52, %v1382_v56 }
 0x3d4   : > { %v1391_v59 = vsel %vm1388_vm1, %v1390_v58, %v1386_v42 }
 0x3d5   : > { %v1412_v60 = vpack.c.bf16 %v1391_v59, %v1391_v59 }
 0x3d7   : > { %1907 = vmatmul.msk.bf16.vlgmr.msrb.gmra.mxu3 %vm1461_vm2, %v1412_v60  ;;  %1908 = vmatmul.msk.bf16.vlgmr.msra.gmra.mxu0 %vm1461_vm2, %v1412_v60 }
 0x3d8   : > { %1909 = vmatmul.msk.bf16.vlgmr.msra.gmra.mxu1 %vm1461_vm2, %v1412_v60  ;;  %1910 = vmatmul.msk.bf16.vlgmr.msra.gmra.mxu2 %vm1461_vm2, %v1412_v60 }
 0x433   : > { %v1370_v35 = vpop.f32.mrf.mxu2 }
 0x434   : > { %v1371_v20 = vadd.f32 %v1370_v35, %v1348_v17 }
 0x436   : > { %v1874_v21 = vmul.f32 -1.442695, %v1371_v20 }
 0x438   : > { %2058 = vpow2.f32 %v1874_v21 }
 0x43b   : > { %v1372_v23 = vpop.f32.mrf.mxu2 }
 0x43e   : > { %v2059_v24 = vpop.eup %2058 }
 0x43f   : > { %v1396_v25 = vadd.f32 1.0, %v2059_v24 }
 0x441   : > { %2060 = vrcp.f32 %v1396_v25  ;;  %v1408_v53 = vand.u32 2147483648, %v1396_v25  ;;  %v1406_v49 = vand.u32 2147483647, %v1396_v25  ;;  %vm1402_vm4 = vweird.f32 %v1396_v25 }
 0x443   : > { %v1409_v57 = vor.u32 1.1754944e-38, %v1408_v53  ;;  %vm1407_vm6 = vcmp.eq.f32.partialorder %v1406_v49, 8.507059e+37 }
 0x447   : > { %v2061_v27 = vpop.eup %2060 }
 0x448   : > { %v1398_v34 = vmul.f32 %v2061_v27, %v1396_v25  ;;  %vm1403_vm3 = vweird.f32 %v2061_v27 }
 0x449   : > { %vm1404_vm5 = vmor %vm1402_vm4, %vm1403_vm3 }
 0x44a   : > { %v1399_v37 = vsub.f32 1.0, %v1398_v34 }
 0x44c   : > { %v1400_v0 = vmul.f32 %v2061_v27, %v1399_v37 }
 0x44e   : > { %v1401_v10 = vadd.f32 %v2061_v27, %v1400_v0 }
 0x450   : > { %v1405_v19 = vsel %vm1404_vm5, %v2061_v27, %v1401_v10 }
 0x451   : > { %v1410_v28 = vsel %vm1407_vm6, %v1409_v57, %v1405_v19 }
 0x452   : > { %v1517_v29 = vpack.c.bf16 %v1410_v28, %v1410_v28 }
 0x454   : > { %v1487_v50 = vpop.f32.mrf.mxu0  ;;  %1943 = vmatmul.msk.bf16.vlgmr.msra.gmra.mxu3 %vm1461_vm2, %v1517_v29  ;;  %1944 = vmatmul.msk.bf16.vlgmr.msrb.gmra.mxu0 %vm1461_vm2, %v1517_v29 }
 0x455   : > { %v1500_v30 = vpop.f32.mrf.mxu1  ;;  %1945 = vmatmul.msk.bf16.vlgmr.msrb.gmra.mxu1 %vm1461_vm2, %v1517_v29  ;;  %1946 = vmatmul.msk.bf16.vlgmr.msrb.gmra.mxu2 %vm1461_vm2, %v1517_v29  ;;  %v1625_v32 = vrot.slane %v1487_v50, 4 }
 0x45a   : > { %v1474_v1 = vpop.f32.mrf.mxu3 }
 0x45b   : > { %v1627_v46 = vsel %vm727_vm7, %v1474_v1, %v1625_v32  ;;  %v1513_v33 = vpop.f32.mrf.mxu2 }
 0x45c   : > { %v1626_v48 = vrot.slane %v1513_v33, 4  ;;  %v1489_v52 = vpop.f32.mrf.mxu0  ;;  %v1631_v42 = vmul.f32 %v1627_v46, %v955_v45 }
 0x45d   : > { %v1502_v54 = vpop.f32.mrf.mxu1 }
 0x45e   : > { %v1628_v36 = vsel %vm727_vm7, %v1500_v30, %v1626_v48 }
 0x45f   : > { %v1632_v63 = vmul.f32 %v1628_v36, %v956_v26 }
 0x462   : > { %v1476_v43 = vpop.f32.mrf.mxu3 }
 0x463   : > { %v1515_v31 = vpop.f32.mrf.mxu2 }
 0x4d1   : > { %v1591_v55 = vpop.f32.mrf.mxu0 }
 0x4d2   : > { %v1604_v56 = vpop.f32.mrf.mxu1  ;;  %v1637_v58 = vrot.slane %v1591_v55, 4 }
 0x4d7   : > { %v1578_v59 = vpop.f32.mrf.mxu3 }
 0x4d8   : > { %v1639_v60 = vsel %vm727_vm7, %v1578_v59, %v1637_v58  ;;  %v1617_v47 = vpop.f32.mrf.mxu2 }
 0x4d9   : > { %v1643_v61 = vmul.f32 %v1639_v60, %v1631_v42  ;;  %v1638_v62 = vrot.slane %v1617_v47, 4  ;;  %v1593_v44 = vpop.f32.mrf.mxu0 }
 0x4da   : > { %v1606_v41 = vpop.f32.mrf.mxu1 }
 0x4db   : > { %1645 = vst [vmem:[%s461_s20] sm:$0xff] %v1643_v61  ;;  %v1640_v2 = vsel %vm727_vm7, %v1604_v56, %v1638_v62 }
 0x4dc   : > { %v1644_v51 = vmul.f32 %v1640_v2, %v1632_v63 }
 0x4de   : > { %1646 = vst [vmem:[%s461_s20 + $0x8] sm:$0xff] %v1644_v51 }
 0x4df   : > { %v1580_v45 = vpop.f32.mrf.mxu3 }
 0x4e0   : > { %2089 = shalt.err (!%p2086_p3)
}
 0x4e1   : > { %2002 = dma.vmem_to_hbm [thread:$0]  (%p2249_p5), %s1662_s21, 256, %s1664_s17, %s1648_s25   ;;  %v1619_v22 = vpop.f32.mrf.mxu2 }
 0x4e2 PF: > { %p2008_p4 = scmp.ge.s32.totalorder %s2124_s16, 2  ;;  %s1675_s27 = sand.u32 1, %s2112_s29  }
 0x4e3   : > { %s1676_s20 = scalar_lea.sflag [#allocation3], %s1675_s27 }
 0x4e4   : > { %p2005_p7 = pnand %p2008_p4, %p2253_p6 }
 0x4e6   : > { %p2006_p8 = pneg %p2005_p7 }
 0x4e8   : > { %2107 = dma.done.wait (%p2006_p8), %s1676_s20, 256  }
 0x4e9   : > { %2109 = vsyncadd (%p2006_p8), %s1676_s20, 4294967040  ;;  %p24_p9 = scmp.ge.s32.totalorder %s2236_s19, 4   ;;  %s2865_s29 = smov %s2116_s30 }
 0x4ea   : > { %s2866_s30 = smov %s2120_s15  ;;  %s2867_s15 = smov %s2247_s22 }
 0x4eb   : > { %s2868_s16 = smov %s2236_s19  ;;  %26 = sbr.rel (!%p24_p9) target bundleno = 8 (0x8), region = 121 }
 0x4f0   :  { %1682 = vsyncpa [#allocation3], 1 }
 0x4f1   :  { %1684 = vsyncpa [#allocation3 + $0x1], 1 }

</bundles_post_ra>
